<compile_context>
chip_gen: v7x
topology: tpu7x:2x2x1
jax: 0.10.0
libtpu: 0.0.40
codegen_flags: <defaults>
</compile_context>

<pallas_src>
import functools
import math

import jax
import jax.numpy as jnp
from jax.experimental import pallas as pl
from jax.experimental.pallas import tpu as pltpu

EPS = 1e-5


# ---------------------------------------------------------------------------
# in-kernel helpers
# ---------------------------------------------------------------------------
def _batchnorm_train(x, gamma, beta):
    # BatchNorm1d on [N, C] in train mode: stats over the batch (sublane) axis.
    mu = jnp.mean(x, axis=0, keepdims=True)
    var = jnp.mean((x - mu) * (x - mu), axis=0, keepdims=True)
    return (x - mu) * jax.lax.rsqrt(var + EPS) * gamma + beta


def _cross_attention_tail(q, k, v, m, g1, b1, g2, b2):
    # q already carries the 1/sqrt(H1) scale and its bias; k/v/m carry biases.
    s = jax.lax.dot_general(q, k, (((1,), (1,)), ((), ())),
                            preferred_element_type=jnp.float32)
    mx = jnp.max(s, axis=-1, keepdims=True)
    e = jnp.exp(s - mx)
    attn = e / jnp.sum(e, axis=-1, keepdims=True)          # exact softmax
    attended = jnp.dot(attn, v, preferred_element_type=jnp.float32)
    resid = jnp.maximum(_batchnorm_train(m, g1, b1), 0.0)
    return _batchnorm_train(attended + resid, g2, b2)


# ---------------------------------------------------------------------------
# fused kernel: CA1 + CA2 + 2-head MHA (scrambled fc) + BN/ReLU + feed-forward
# ---------------------------------------------------------------------------
def _bicross_kernel(f1_ref, f2_ref, wproj_ref, bproj_ref, wqk_ref, wvp_ref,
                    wtail_ref, vecs_ref, out_ref, *, H1, N, H2P):
    f32 = jnp.float32
    D = 2 * H1
    KK = D // N

    f1 = f1_ref[...]
    f2 = f2_ref[...]
    vecs = vecs_ref[...]

    # ---- fused input projections: one block-diagonal [N, 8*H1] matmul ------
    # column layout: [Q1*s | M1 | K2 | V2 | Q2*s | M2 | K1 | V1]
    fcat = jnp.concatenate([f1, f2], axis=1)
    proj = (jnp.dot(fcat, wproj_ref[...], preferred_element_type=f32)
            + bproj_ref[...])

    q1, m1 = proj[:, 0:H1], proj[:, H1:2 * H1]
    k2, v2 = proj[:, 2 * H1:3 * H1], proj[:, 3 * H1:4 * H1]
    q2, m2 = proj[:, 4 * H1:5 * H1], proj[:, 5 * H1:6 * H1]
    k1, v1 = proj[:, 6 * H1:7 * H1], proj[:, 7 * H1:8 * H1]

    a1 = _cross_attention_tail(q1, k1, v1, m1,
                               vecs[0:1, 0:H1], vecs[1:2, 0:H1],
                               vecs[2:3, 0:H1], vecs[3:4, 0:H1])
    a2 = _cross_attention_tail(q2, k2, v2, m2,
                               vecs[4:5, 0:H1], vecs[5:6, 0:H1],
                               vecs[6:7, 0:H1], vecs[7:8, 0:H1])
    all_att = jnp.concatenate([a1, a2], axis=1)             # [N, 2*H1]

    # ---- MultiHeadAttention (2 heads), MHA scale folded into Q weights -----
    qk = jnp.dot(all_att, wqk_ref[...], preferred_element_type=f32)  # [N,4H1]
    # V in feature-major form with the scramble row-permutation folded into
    # the weights (prepare time):  vtp = Wvp @ all_att^T  (A @ B^T on MXU).
    vtp = jax.lax.dot_general(wvp_ref[...], all_att, (((1,), (1,)), ((), ())),
                              preferred_element_type=f32)   # [2D, N]

    ct = None
    for h in range(2):
        qh = qk[:, h * H1:(h + 1) * H1]
        kh = qk[:, 2 * H1 + h * H1:2 * H1 + (h + 1) * H1]
        # transposed scores: [keys, queries]
        sT = jax.lax.dot_general(kh, qh, (((1,), (1,)), ((), ())),
                                 preferred_element_type=f32)
        mx = jnp.max(sT, axis=0, keepdims=True)
        e = jnp.exp(sT - mx)
        attnT = e / jnp.sum(e, axis=0, keepdims=True)       # softmax over keys
        term = jnp.dot(vtp[h * D:(h + 1) * D, :], attnT,
                       preferred_element_type=f32)          # [D, N]
        ct = term if ct is None else ct + term

    # PyTorch's context.transpose(1,2).reshape(N, 2*H1): with the permutation
    # folded into wvp it reduces to laying KK [N, N] sublane blocks of ct
    # side by side along lanes, then one matmul with Wfc^T.
    scrambled = jnp.concatenate(
        [ct[m * N:(m + 1) * N, :] for m in range(KK)], axis=1)   # [N, 2*H1]
    mha_out = jnp.dot(scrambled, wtail_ref[0:D, 0:D],
                      preferred_element_type=f32)                # [N, 2*H1]

    # ---- residual + BatchNorm + ReLU + feed-forward -------------------------
    x = jnp.maximum(
        _batchnorm_train(mha_out + all_att, vecs[8:9, 0:D], vecs[9:10, 0:D]),
        0.0)
    hmid = jnp.maximum(
        jnp.dot(x, wtail_ref[0:D, D:D + H1], preferred_element_type=f32)
        + vecs[10:11, 0:H1], 0.0)
    out_ref[...] = (jnp.dot(hmid, wtail_ref[D:D + H1, 0:H2P],
                            preferred_element_type=f32)
                    + vecs[11:12, 0:H2P])


# ---------------------------------------------------------------------------
# one-time weight preparation (hoisted OUT of the per-call path)
# ---------------------------------------------------------------------------
def prepare_params(params, batch_rows):
    """Fuses / transposes / pads all weights once. Result depends on N because
    the PyTorch transpose(1,2).reshape quirk mixes batch rows with features."""
    N = batch_rows
    ca1, ca2, mha, ff = params["ca1"], params["ca2"], params["mha"], params["ff"]
    H1 = ca1["Wq"].shape[0]
    FD1 = ca1["Wq"].shape[1]
    FD2 = ca2["Wq"].shape[1]
    H2 = ff["W2"].shape[0]
    D = 2 * H1
    if D % N != 0:
        # TODO(synk): general-N scramble (N not dividing 2*hidden_dim1) needs a
        # per-(row,col) selector; not implemented in this fused formulation.
        raise NotImplementedError("fused kernel requires N | 2*hidden_dim1")
    if D > 128 or H1 > 128 or H2 > 128:
        raise NotImplementedError("packed-slab layout assumes dims <= 128")

    scale = 1.0 / math.sqrt(float(H1))   # CA scale and MHA d_k scale (d_k=H1)
    f32 = jnp.float32

    # Block-diagonal fused projection [FD1+FD2, 8*H1] (weights as [in, out]).
    wA = jnp.concatenate([ca1["Wq"].T * scale, ca1["Wm"].T,
                          ca2["Wk"].T, ca2["Wv"].T], axis=1)
    wB = jnp.concatenate([ca2["Wq"].T * scale, ca2["Wm"].T,
                          ca1["Wk"].T, ca1["Wv"].T], axis=1)
    wproj = jnp.zeros((FD1 + FD2, 8 * H1), f32)
    wproj = wproj.at[:FD1, :4 * H1].set(wA)
    wproj = wproj.at[FD1:, 4 * H1:].set(wB)
    bproj = jnp.concatenate(
        [ca1["bq"] * scale, ca1["bm"], ca2["bk"], ca2["bv"],
         ca2["bq"] * scale, ca2["bm"], ca1["bk"], ca1["bv"]])[None, :].astype(f32)

    # MHA Q|K fused [D, 2D], scale folded into Q columns (no biases in MHA).
    wqk = jnp.concatenate([mha["WQ"].T * scale, mha["WK"].T], axis=1).astype(f32)

    # Fold the transpose(1,2).reshape row permutation into the V weights:
    # ct row r of the stacked transposed context goes to row (r%kk)*N + r//kk.
    kk = D // N
    r = jnp.arange(D)
    perm = (r % kk) * N + r // kk
    wv = mha["WV"]                               # torch layout [out, in]
    wvp0 = jnp.zeros((D, D), f32).at[perm[:H1]].set(wv[:H1, :])
    wvp1 = jnp.zeros((D, D), f32).at[perm[H1:]].set(wv[H1:, :])
    wvp = jnp.concatenate([wvp0, wvp1], axis=0)  # [2D, D]

    # Tail-weight slab: Wfc^T | W_ff1^T on rows 0:D, W_ff2^T (lane-padded) below.
    H2P = ((H2 + 127) // 128) * 128
    WT = max(D + H1, H2P)
    wtail = jnp.zeros((D + H1, WT), f32)
    wtail = wtail.at[:D, :D].set(mha["Wfc"].T)
    wtail = wtail.at[:D, D:D + H1].set(ff["W1"].T)
    wtail = wtail.at[D:, :H2].set(ff["W2"].T)

    # Small-vector slab: BN params of both CAs, BiCross bn1, FF biases.
    VW = max(128, D, H2P)
    vecs = jnp.zeros((12, VW), f32)
    vecs = vecs.at[0, :H1].set(ca1["bn1_g"]).at[1, :H1].set(ca1["bn1_b"])
    vecs = vecs.at[2, :H1].set(ca1["bn2_g"]).at[3, :H1].set(ca1["bn2_b"])
    vecs = vecs.at[4, :H1].set(ca2["bn1_g"]).at[5, :H1].set(ca2["bn1_b"])
    vecs = vecs.at[6, :H1].set(ca2["bn2_g"]).at[7, :H1].set(ca2["bn2_b"])
    vecs = vecs.at[8, :D].set(params["bn1_g"]).at[9, :D].set(params["bn1_b"])
    vecs = vecs.at[10, :H1].set(ff["b1"])
    vecs = vecs.at[11, :H2].set(ff["b2"])

    return {"wproj": wproj, "bproj": bproj, "wqk": wqk, "wvp": wvp,
            "wtail": wtail, "vecs": vecs}


# ---------------------------------------------------------------------------
# forward: single grid-less pallas_call on pre-fused weights
# ---------------------------------------------------------------------------
def bi_cross_attention(features1, features2, prep, *, hidden_dim2):
    N = features1.shape[0]
    D = prep["wqk"].shape[0]
    H1 = D // 2
    H2P = ((hidden_dim2 + 127) // 128) * 128

    vmem = pl.BlockSpec(memory_space=pltpu.MemorySpace.VMEM)
    inputs = (features1, features2, prep["wproj"], prep["bproj"], prep["wqk"],
              prep["wvp"], prep["wtail"], prep["vecs"])

    out_padded = pl.pallas_call(
        functools.partial(_bicross_kernel, H1=H1, N=N, H2P=H2P),
        out_shape=jax.ShapeDtypeStruct((N, H2P), jnp.float32),
        in_specs=[vmem] * len(inputs),
        out_specs=vmem,
    )(*inputs)
    return out_padded[:, :hidden_dim2]


# ---------------------------------------------------------------------------
# Deterministic parameter init (PyTorch Linear uniform bounds, BN defaults)
# ---------------------------------------------------------------------------
def init_params(key, fd1, fd2, H1, H2):
    keys = iter(jax.random.split(key, 32))

    def lin_w(out_d, in_d):
        bound = 1.0 / math.sqrt(in_d)
        return jax.random.uniform(next(keys), (out_d, in_d), jnp.float32,
                                  -bound, bound)

    def lin_b(out_d, in_d):
        bound = 1.0 / math.sqrt(in_d)
        return jax.random.uniform(next(keys), (out_d,), jnp.float32,
                                  -bound, bound)

    def ca(fd_q, fd_kv, H):
        return {
            "Wq": lin_w(H, fd_q), "bq": lin_b(H, fd_q),
            "Wk": lin_w(H, fd_kv), "bk": lin_b(H, fd_kv),
            "Wv": lin_w(H, fd_kv), "bv": lin_b(H, fd_kv),
            "Wm": lin_w(H, fd_q), "bm": lin_b(H, fd_q),
            "bn1_g": jnp.ones((H,), jnp.float32),
            "bn1_b": jnp.zeros((H,), jnp.float32),
            "bn2_g": jnp.ones((H,), jnp.float32),
            "bn2_b": jnp.zeros((H,), jnp.float32),
        }

    return {
        "ca1": ca(fd1, fd2, H1),
        "ca2": ca(fd2, fd1, H1),
        "mha": {
            "WQ": lin_w(2 * H1, 2 * H1), "WK": lin_w(2 * H1, 2 * H1),
            "WV": lin_w(2 * H1, 2 * H1), "Wfc": lin_w(2 * H1, 2 * H1),
        },
        "bn1_g": jnp.ones((2 * H1,), jnp.float32),
        "bn1_b": jnp.zeros((2 * H1,), jnp.float32),
        "ff": {
            "W1": lin_w(H1, 2 * H1), "b1": lin_b(H1, 2 * H1),
            "W2": lin_w(H2, H1), "b2": lin_b(H2, H1),
        },
    }


if __name__ == "__main__":
    N, FD1, FD2, H1, H2 = 8, 16, 24, 32, 16
    key = jax.random.PRNGKey(0)
    k1, k2, kp = jax.random.split(key, 3)
    features1 = jax.random.normal(k1, (N, FD1), jnp.float32)
    features2 = jax.random.normal(k2, (N, FD2), jnp.float32)
    params = init_params(kp, FD1, FD2, H1, H2)

    # One-time weight preparation, hoisted out of the per-call path.
    prep = jax.tree_util.tree_map(jax.block_until_ready,
                                  prepare_params(params, batch_rows=N))

    fwd = jax.jit(functools.partial(bi_cross_attention, hidden_dim2=H2))
    out = jax.block_until_ready(fwd(features1, features2, prep))
    assert out.shape == (N, H2) and out.dtype == jnp.float32
    assert bool(jnp.all(jnp.isfinite(out)))
    print("KERNEL_OK")
</pallas_src>

<mosaic_0001>
module attributes {stable_mosaic.version = 11 : i64} {
  func.func @_bicross_kernel(%arg0: memref<8x16xf32, #tpu.memory_space<vmem>>, %arg1: memref<8x24xf32, #tpu.memory_space<vmem>>, %arg2: memref<40x256xf32, #tpu.memory_space<vmem>>, %arg3: memref<1x256xf32, #tpu.memory_space<vmem>>, %arg4: memref<64x128xf32, #tpu.memory_space<vmem>>, %arg5: memref<128x64xf32, #tpu.memory_space<vmem>>, %arg6: memref<96x128xf32, #tpu.memory_space<vmem>>, %arg7: memref<12x128xf32, #tpu.memory_space<vmem>>, %arg8: memref<8x128xf32, #tpu.memory_space<vmem>>) attributes {dimension_semantics = [], scalar_prefetch = 0 : i64, scratch_operands = 0 : i64, tpu.core_type = #tpu.core_type<tc>} {
    %c0 = arith.constant 0 : index
    %c0_0 = arith.constant 0 : index
    %0 = vector.load %arg0[%c0, %c0_0] : memref<8x16xf32, #tpu.memory_space<vmem>>, vector<8x16xf32>
    %c0_1 = arith.constant 0 : index
    %c0_2 = arith.constant 0 : index
    %1 = vector.load %arg1[%c0_1, %c0_2] : memref<8x24xf32, #tpu.memory_space<vmem>>, vector<8x24xf32>
    %c0_3 = arith.constant 0 : index
    %c0_4 = arith.constant 0 : index
    %2 = vector.load %arg7[%c0_3, %c0_4] : memref<12x128xf32, #tpu.memory_space<vmem>>, vector<12x128xf32>
    %3 = tpu.concatenate %0, %1 in 1 : vector<8x16xf32>, vector<8x24xf32> -> vector<8x40xf32>
    %c0_5 = arith.constant 0 : index
    %c0_6 = arith.constant 0 : index
    %4 = vector.load %arg2[%c0_5, %c0_6] : memref<40x256xf32, #tpu.memory_space<vmem>>, vector<40x256xf32>
    %cst = arith.constant dense<0.000000e+00> : vector<8x256xf32>
    %5 = tpu.matmul %3, %4, %cst {dimension_numbers = #tpu.dot_dimension_numbers<[1], [0], [0], [1], [0, 0, 1, 1], [], []>} : vector<8x40xf32>, vector<40x256xf32>, vector<8x256xf32> -> vector<8x256xf32>
    %c0_7 = arith.constant 0 : index
    %c0_8 = arith.constant 0 : index
    %6 = vector.load %arg3[%c0_7, %c0_8] : memref<1x256xf32, #tpu.memory_space<vmem>>, vector<1x256xf32>
    %7 = vector.broadcast %6 : vector<1x256xf32> to vector<8x256xf32>
    %8 = arith.addf %5, %7 : vector<8x256xf32>
    %9 = vector.extract_strided_slice %8 {offsets = [0, 0], sizes = [8, 32], strides = [1, 1]} : vector<8x256xf32> to vector<8x32xf32>
    %10 = vector.extract_strided_slice %8 {offsets = [0, 32], sizes = [8, 32], strides = [1, 1]} : vector<8x256xf32> to vector<8x32xf32>
    %11 = vector.extract_strided_slice %8 {offsets = [0, 64], sizes = [8, 32], strides = [1, 1]} : vector<8x256xf32> to vector<8x32xf32>
    %12 = vector.extract_strided_slice %8 {offsets = [0, 96], sizes = [8, 32], strides = [1, 1]} : vector<8x256xf32> to vector<8x32xf32>
    %13 = vector.extract_strided_slice %8 {offsets = [0, 128], sizes = [8, 32], strides = [1, 1]} : vector<8x256xf32> to vector<8x32xf32>
    %14 = vector.extract_strided_slice %8 {offsets = [0, 160], sizes = [8, 32], strides = [1, 1]} : vector<8x256xf32> to vector<8x32xf32>
    %15 = vector.extract_strided_slice %8 {offsets = [0, 192], sizes = [8, 32], strides = [1, 1]} : vector<8x256xf32> to vector<8x32xf32>
    %16 = vector.extract_strided_slice %8 {offsets = [0, 224], sizes = [8, 32], strides = [1, 1]} : vector<8x256xf32> to vector<8x32xf32>
    %17 = vector.extract_strided_slice %2 {offsets = [0, 0], sizes = [1, 32], strides = [1, 1]} : vector<12x128xf32> to vector<1x32xf32>
    %18 = vector.extract_strided_slice %2 {offsets = [1, 0], sizes = [1, 32], strides = [1, 1]} : vector<12x128xf32> to vector<1x32xf32>
    %19 = vector.extract_strided_slice %2 {offsets = [2, 0], sizes = [1, 32], strides = [1, 1]} : vector<12x128xf32> to vector<1x32xf32>
    %20 = vector.extract_strided_slice %2 {offsets = [3, 0], sizes = [1, 32], strides = [1, 1]} : vector<12x128xf32> to vector<1x32xf32>
    %cst_9 = arith.constant dense<0.000000e+00> : vector<8x8xf32>
    %21 = tpu.matmul %9, %15, %cst_9 {dimension_numbers = #tpu.dot_dimension_numbers<[1], [1], [0], [0], [0, 0, 1, 0], [], []>} : vector<8x32xf32>, vector<8x32xf32>, vector<8x8xf32> -> vector<8x8xf32>
    %cst_10 = arith.constant dense<0xFF800000> : vector<8xf32>
    %22 = vector.multi_reduction <maximumf>, %21, %cst_10 [1] : vector<8x8xf32> to vector<8xf32>
    %23 = vector.shape_cast %22 : vector<8xf32> to vector<8x1xf32>
    %24 = vector.broadcast %23 : vector<8x1xf32> to vector<8x8xf32>
    %25 = arith.subf %21, %24 : vector<8x8xf32>
    %26 = math.exp %25 : vector<8x8xf32>
    %cst_11 = arith.constant dense<0.000000e+00> : vector<8xf32>
    %27 = vector.multi_reduction <add>, %26, %cst_11 [1] : vector<8x8xf32> to vector<8xf32>
    %28 = vector.shape_cast %27 : vector<8xf32> to vector<8x1xf32>
    %29 = vector.broadcast %28 : vector<8x1xf32> to vector<8x8xf32>
    %30 = arith.divf %26, %29 : vector<8x8xf32>
    %cst_12 = arith.constant dense<0.000000e+00> : vector<8x32xf32>
    %31 = tpu.matmul %30, %16, %cst_12 {dimension_numbers = #tpu.dot_dimension_numbers<[1], [0], [0], [1], [0, 0, 1, 1], [], []>} : vector<8x8xf32>, vector<8x32xf32>, vector<8x32xf32> -> vector<8x32xf32>
    %cst_13 = arith.constant dense<0.000000e+00> : vector<32xf32>
    %32 = vector.multi_reduction <add>, %10, %cst_13 [0] : vector<8x32xf32> to vector<32xf32>
    %33 = vector.shape_cast %32 : vector<32xf32> to vector<1x32xf32>
    %cst_14 = arith.constant 8.000000e+00 : f32
    %34 = vector.broadcast %cst_14 : f32 to vector<1x32xf32>
    %35 = arith.divf %33, %34 : vector<1x32xf32>
    %36 = vector.broadcast %35 : vector<1x32xf32> to vector<8x32xf32>
    %37 = arith.subf %10, %36 : vector<8x32xf32>
    %38 = vector.broadcast %35 : vector<1x32xf32> to vector<8x32xf32>
    %39 = arith.subf %10, %38 : vector<8x32xf32>
    %40 = arith.mulf %37, %39 : vector<8x32xf32>
    %cst_15 = arith.constant dense<0.000000e+00> : vector<32xf32>
    %41 = vector.multi_reduction <add>, %40, %cst_15 [0] : vector<8x32xf32> to vector<32xf32>
    %42 = vector.shape_cast %41 : vector<32xf32> to vector<1x32xf32>
    %cst_16 = arith.constant 8.000000e+00 : f32
    %43 = vector.broadcast %cst_16 : f32 to vector<1x32xf32>
    %44 = arith.divf %42, %43 : vector<1x32xf32>
    %45 = vector.broadcast %35 : vector<1x32xf32> to vector<8x32xf32>
    %46 = arith.subf %10, %45 : vector<8x32xf32>
    %cst_17 = arith.constant 9.99999974E-6 : f32
    %47 = vector.broadcast %cst_17 : f32 to vector<1x32xf32>
    %48 = arith.addf %44, %47 : vector<1x32xf32>
    %49 = math.rsqrt %48 : vector<1x32xf32>
    %50 = vector.broadcast %49 : vector<1x32xf32> to vector<8x32xf32>
    %51 = arith.mulf %46, %50 : vector<8x32xf32>
    %52 = vector.broadcast %17 : vector<1x32xf32> to vector<8x32xf32>
    %53 = arith.mulf %51, %52 : vector<8x32xf32>
    %54 = vector.broadcast %18 : vector<1x32xf32> to vector<8x32xf32>
    %55 = arith.addf %53, %54 : vector<8x32xf32>
    %cst_18 = arith.constant 0.000000e+00 : f32
    %56 = vector.broadcast %cst_18 : f32 to vector<8x32xf32>
    %57 = arith.maximumf %55, %56 : vector<8x32xf32>
    %58 = arith.addf %31, %57 : vector<8x32xf32>
    %cst_19 = arith.constant dense<0.000000e+00> : vector<32xf32>
    %59 = vector.multi_reduction <add>, %58, %cst_19 [0] : vector<8x32xf32> to vector<32xf32>
    %60 = vector.shape_cast %59 : vector<32xf32> to vector<1x32xf32>
    %cst_20 = arith.constant 8.000000e+00 : f32
    %61 = vector.broadcast %cst_20 : f32 to vector<1x32xf32>
    %62 = arith.divf %60, %61 : vector<1x32xf32>
    %63 = vector.broadcast %62 : vector<1x32xf32> to vector<8x32xf32>
    %64 = arith.subf %58, %63 : vector<8x32xf32>
    %65 = vector.broadcast %62 : vector<1x32xf32> to vector<8x32xf32>
    %66 = arith.subf %58, %65 : vector<8x32xf32>
    %67 = arith.mulf %64, %66 : vector<8x32xf32>
    %cst_21 = arith.constant dense<0.000000e+00> : vector<32xf32>
    %68 = vector.multi_reduction <add>, %67, %cst_21 [0] : vector<8x32xf32> to vector<32xf32>
    %69 = vector.shape_cast %68 : vector<32xf32> to vector<1x32xf32>
    %cst_22 = arith.constant 8.000000e+00 : f32
    %70 = vector.broadcast %cst_22 : f32 to vector<1x32xf32>
    %71 = arith.divf %69, %70 : vector<1x32xf32>
    %72 = vector.broadcast %62 : vector<1x32xf32> to vector<8x32xf32>
    %73 = arith.subf %58, %72 : vector<8x32xf32>
    %cst_23 = arith.constant 9.99999974E-6 : f32
    %74 = vector.broadcast %cst_23 : f32 to vector<1x32xf32>
    %75 = arith.addf %71, %74 : vector<1x32xf32>
    %76 = math.rsqrt %75 : vector<1x32xf32>
    %77 = vector.broadcast %76 : vector<1x32xf32> to vector<8x32xf32>
    %78 = arith.mulf %73, %77 : vector<8x32xf32>
    %79 = vector.broadcast %19 : vector<1x32xf32> to vector<8x32xf32>
    %80 = arith.mulf %78, %79 : vector<8x32xf32>
    %81 = vector.broadcast %20 : vector<1x32xf32> to vector<8x32xf32>
    %82 = arith.addf %80, %81 : vector<8x32xf32>
    %83 = vector.extract_strided_slice %2 {offsets = [4, 0], sizes = [1, 32], strides = [1, 1]} : vector<12x128xf32> to vector<1x32xf32>
    %84 = vector.extract_strided_slice %2 {offsets = [5, 0], sizes = [1, 32], strides = [1, 1]} : vector<12x128xf32> to vector<1x32xf32>
    %85 = vector.extract_strided_slice %2 {offsets = [6, 0], sizes = [1, 32], strides = [1, 1]} : vector<12x128xf32> to vector<1x32xf32>
    %86 = vector.extract_strided_slice %2 {offsets = [7, 0], sizes = [1, 32], strides = [1, 1]} : vector<12x128xf32> to vector<1x32xf32>
    %cst_24 = arith.constant dense<0.000000e+00> : vector<8x8xf32>
    %87 = tpu.matmul %13, %11, %cst_24 {dimension_numbers = #tpu.dot_dimension_numbers<[1], [1], [0], [0], [0, 0, 1, 0], [], []>} : vector<8x32xf32>, vector<8x32xf32>, vector<8x8xf32> -> vector<8x8xf32>
    %cst_25 = arith.constant dense<0xFF800000> : vector<8xf32>
    %88 = vector.multi_reduction <maximumf>, %87, %cst_25 [1] : vector<8x8xf32> to vector<8xf32>
    %89 = vector.shape_cast %88 : vector<8xf32> to vector<8x1xf32>
    %90 = vector.broadcast %89 : vector<8x1xf32> to vector<8x8xf32>
    %91 = arith.subf %87, %90 : vector<8x8xf32>
    %92 = math.exp %91 : vector<8x8xf32>
    %cst_26 = arith.constant dense<0.000000e+00> : vector<8xf32>
    %93 = vector.multi_reduction <add>, %92, %cst_26 [1] : vector<8x8xf32> to vector<8xf32>
    %94 = vector.shape_cast %93 : vector<8xf32> to vector<8x1xf32>
    %95 = vector.broadcast %94 : vector<8x1xf32> to vector<8x8xf32>
    %96 = arith.divf %92, %95 : vector<8x8xf32>
    %cst_27 = arith.constant dense<0.000000e+00> : vector<8x32xf32>
    %97 = tpu.matmul %96, %12, %cst_27 {dimension_numbers = #tpu.dot_dimension_numbers<[1], [0], [0], [1], [0, 0, 1, 1], [], []>} : vector<8x8xf32>, vector<8x32xf32>, vector<8x32xf32> -> vector<8x32xf32>
    %cst_28 = arith.constant dense<0.000000e+00> : vector<32xf32>
    %98 = vector.multi_reduction <add>, %14, %cst_28 [0] : vector<8x32xf32> to vector<32xf32>
    %99 = vector.shape_cast %98 : vector<32xf32> to vector<1x32xf32>
    %cst_29 = arith.constant 8.000000e+00 : f32
    %100 = vector.broadcast %cst_29 : f32 to vector<1x32xf32>
    %101 = arith.divf %99, %100 : vector<1x32xf32>
    %102 = vector.broadcast %101 : vector<1x32xf32> to vector<8x32xf32>
    %103 = arith.subf %14, %102 : vector<8x32xf32>
    %104 = vector.broadcast %101 : vector<1x32xf32> to vector<8x32xf32>
    %105 = arith.subf %14, %104 : vector<8x32xf32>
    %106 = arith.mulf %103, %105 : vector<8x32xf32>
    %cst_30 = arith.constant dense<0.000000e+00> : vector<32xf32>
    %107 = vector.multi_reduction <add>, %106, %cst_30 [0] : vector<8x32xf32> to vector<32xf32>
    %108 = vector.shape_cast %107 : vector<32xf32> to vector<1x32xf32>
    %cst_31 = arith.constant 8.000000e+00 : f32
    %109 = vector.broadcast %cst_31 : f32 to vector<1x32xf32>
    %110 = arith.divf %108, %109 : vector<1x32xf32>
    %111 = vector.broadcast %101 : vector<1x32xf32> to vector<8x32xf32>
    %112 = arith.subf %14, %111 : vector<8x32xf32>
    %cst_32 = arith.constant 9.99999974E-6 : f32
    %113 = vector.broadcast %cst_32 : f32 to vector<1x32xf32>
    %114 = arith.addf %110, %113 : vector<1x32xf32>
    %115 = math.rsqrt %114 : vector<1x32xf32>
    %116 = vector.broadcast %115 : vector<1x32xf32> to vector<8x32xf32>
    %117 = arith.mulf %112, %116 : vector<8x32xf32>
    %118 = vector.broadcast %83 : vector<1x32xf32> to vector<8x32xf32>
    %119 = arith.mulf %117, %118 : vector<8x32xf32>
    %120 = vector.broadcast %84 : vector<1x32xf32> to vector<8x32xf32>
    %121 = arith.addf %119, %120 : vector<8x32xf32>
    %cst_33 = arith.constant 0.000000e+00 : f32
    %122 = vector.broadcast %cst_33 : f32 to vector<8x32xf32>
    %123 = arith.maximumf %121, %122 : vector<8x32xf32>
    %124 = arith.addf %97, %123 : vector<8x32xf32>
    %cst_34 = arith.constant dense<0.000000e+00> : vector<32xf32>
    %125 = vector.multi_reduction <add>, %124, %cst_34 [0] : vector<8x32xf32> to vector<32xf32>
    %126 = vector.shape_cast %125 : vector<32xf32> to vector<1x32xf32>
    %cst_35 = arith.constant 8.000000e+00 : f32
    %127 = vector.broadcast %cst_35 : f32 to vector<1x32xf32>
    %128 = arith.divf %126, %127 : vector<1x32xf32>
    %129 = vector.broadcast %128 : vector<1x32xf32> to vector<8x32xf32>
    %130 = arith.subf %124, %129 : vector<8x32xf32>
    %131 = vector.broadcast %128 : vector<1x32xf32> to vector<8x32xf32>
    %132 = arith.subf %124, %131 : vector<8x32xf32>
    %133 = arith.mulf %130, %132 : vector<8x32xf32>
    %cst_36 = arith.constant dense<0.000000e+00> : vector<32xf32>
    %134 = vector.multi_reduction <add>, %133, %cst_36 [0] : vector<8x32xf32> to vector<32xf32>
    %135 = vector.shape_cast %134 : vector<32xf32> to vector<1x32xf32>
    %cst_37 = arith.constant 8.000000e+00 : f32
    %136 = vector.broadcast %cst_37 : f32 to vector<1x32xf32>
    %137 = arith.divf %135, %136 : vector<1x32xf32>
    %138 = vector.broadcast %128 : vector<1x32xf32> to vector<8x32xf32>
    %139 = arith.subf %124, %138 : vector<8x32xf32>
    %cst_38 = arith.constant 9.99999974E-6 : f32
    %140 = vector.broadcast %cst_38 : f32 to vector<1x32xf32>
    %141 = arith.addf %137, %140 : vector<1x32xf32>
    %142 = math.rsqrt %141 : vector<1x32xf32>
    %143 = vector.broadcast %142 : vector<1x32xf32> to vector<8x32xf32>
    %144 = arith.mulf %139, %143 : vector<8x32xf32>
    %145 = vector.broadcast %85 : vector<1x32xf32> to vector<8x32xf32>
    %146 = arith.mulf %144, %145 : vector<8x32xf32>
    %147 = vector.broadcast %86 : vector<1x32xf32> to vector<8x32xf32>
    %148 = arith.addf %146, %147 : vector<8x32xf32>
    %149 = tpu.concatenate %82, %148 in 1 : vector<8x32xf32>, vector<8x32xf32> -> vector<8x64xf32>
    %c0_39 = arith.constant 0 : index
    %c0_40 = arith.constant 0 : index
    %150 = vector.load %arg4[%c0_39, %c0_40] : memref<64x128xf32, #tpu.memory_space<vmem>>, vector<64x128xf32>
    %cst_41 = arith.constant dense<0.000000e+00> : vector<8x128xf32>
    %151 = tpu.matmul %149, %150, %cst_41 {dimension_numbers = #tpu.dot_dimension_numbers<[1], [0], [0], [1], [0, 0, 1, 1], [], []>} : vector<8x64xf32>, vector<64x128xf32>, vector<8x128xf32> -> vector<8x128xf32>
    %c0_42 = arith.constant 0 : index
    %c0_43 = arith.constant 0 : index
    %152 = vector.load %arg5[%c0_42, %c0_43] : memref<128x64xf32, #tpu.memory_space<vmem>>, vector<128x64xf32>
    %cst_44 = arith.constant dense<0.000000e+00> : vector<128x8xf32>
    %153 = tpu.matmul %152, %149, %cst_44 {dimension_numbers = #tpu.dot_dimension_numbers<[1], [1], [0], [0], [0, 0, 1, 0], [], []>} : vector<128x64xf32>, vector<8x64xf32>, vector<128x8xf32> -> vector<128x8xf32>
    %154 = vector.extract_strided_slice %151 {offsets = [0, 0], sizes = [8, 32], strides = [1, 1]} : vector<8x128xf32> to vector<8x32xf32>
    %155 = vector.extract_strided_slice %151 {offsets = [0, 64], sizes = [8, 32], strides = [1, 1]} : vector<8x128xf32> to vector<8x32xf32>
    %cst_45 = arith.constant dense<0.000000e+00> : vector<8x8xf32>
    %156 = tpu.matmul %155, %154, %cst_45 {dimension_numbers = #tpu.dot_dimension_numbers<[1], [1], [0], [0], [0, 0, 1, 0], [], []>} : vector<8x32xf32>, vector<8x32xf32>, vector<8x8xf32> -> vector<8x8xf32>
    %cst_46 = arith.constant dense<0xFF800000> : vector<8xf32>
    %157 = vector.multi_reduction <maximumf>, %156, %cst_46 [0] : vector<8x8xf32> to vector<8xf32>
    %158 = vector.shape_cast %157 : vector<8xf32> to vector<1x8xf32>
    %159 = vector.broadcast %158 : vector<1x8xf32> to vector<8x8xf32>
    %160 = arith.subf %156, %159 : vector<8x8xf32>
    %161 = math.exp %160 : vector<8x8xf32>
    %cst_47 = arith.constant dense<0.000000e+00> : vector<8xf32>
    %162 = vector.multi_reduction <add>, %161, %cst_47 [0] : vector<8x8xf32> to vector<8xf32>
    %163 = vector.shape_cast %162 : vector<8xf32> to vector<1x8xf32>
    %164 = vector.broadcast %163 : vector<1x8xf32> to vector<8x8xf32>
    %165 = arith.divf %161, %164 : vector<8x8xf32>
    %166 = vector.extract_strided_slice %153 {offsets = [0, 0], sizes = [64, 8], strides = [1, 1]} : vector<128x8xf32> to vector<64x8xf32>
    %cst_48 = arith.constant dense<0.000000e+00> : vector<64x8xf32>
    %167 = tpu.matmul %166, %165, %cst_48 {dimension_numbers = #tpu.dot_dimension_numbers<[1], [0], [0], [1], [0, 0, 1, 1], [], []>} : vector<64x8xf32>, vector<8x8xf32>, vector<64x8xf32> -> vector<64x8xf32>
    %168 = vector.extract_strided_slice %151 {offsets = [0, 32], sizes = [8, 32], strides = [1, 1]} : vector<8x128xf32> to vector<8x32xf32>
    %169 = vector.extract_strided_slice %151 {offsets = [0, 96], sizes = [8, 32], strides = [1, 1]} : vector<8x128xf32> to vector<8x32xf32>
    %cst_49 = arith.constant dense<0.000000e+00> : vector<8x8xf32>
    %170 = tpu.matmul %169, %168, %cst_49 {dimension_numbers = #tpu.dot_dimension_numbers<[1], [1], [0], [0], [0, 0, 1, 0], [], []>} : vector<8x32xf32>, vector<8x32xf32>, vector<8x8xf32> -> vector<8x8xf32>
    %cst_50 = arith.constant dense<0xFF800000> : vector<8xf32>
    %171 = vector.multi_reduction <maximumf>, %170, %cst_50 [0] : vector<8x8xf32> to vector<8xf32>
    %172 = vector.shape_cast %171 : vector<8xf32> to vector<1x8xf32>
    %173 = vector.broadcast %172 : vector<1x8xf32> to vector<8x8xf32>
    %174 = arith.subf %170, %173 : vector<8x8xf32>
    %175 = math.exp %174 : vector<8x8xf32>
    %cst_51 = arith.constant dense<0.000000e+00> : vector<8xf32>
    %176 = vector.multi_reduction <add>, %175, %cst_51 [0] : vector<8x8xf32> to vector<8xf32>
    %177 = vector.shape_cast %176 : vector<8xf32> to vector<1x8xf32>
    %178 = vector.broadcast %177 : vector<1x8xf32> to vector<8x8xf32>
    %179 = arith.divf %175, %178 : vector<8x8xf32>
    %180 = vector.extract_strided_slice %153 {offsets = [64, 0], sizes = [64, 8], strides = [1, 1]} : vector<128x8xf32> to vector<64x8xf32>
    %cst_52 = arith.constant dense<0.000000e+00> : vector<64x8xf32>
    %181 = tpu.matmul %180, %179, %cst_52 {dimension_numbers = #tpu.dot_dimension_numbers<[1], [0], [0], [1], [0, 0, 1, 1], [], []>} : vector<64x8xf32>, vector<8x8xf32>, vector<64x8xf32> -> vector<64x8xf32>
    %182 = arith.addf %167, %181 : vector<64x8xf32>
    %183 = vector.extract_strided_slice %182 {offsets = [0, 0], sizes = [8, 8], strides = [1, 1]} : vector<64x8xf32> to vector<8x8xf32>
    %184 = vector.extract_strided_slice %182 {offsets = [8, 0], sizes = [8, 8], strides = [1, 1]} : vector<64x8xf32> to vector<8x8xf32>
    %185 = vector.extract_strided_slice %182 {offsets = [16, 0], sizes = [8, 8], strides = [1, 1]} : vector<64x8xf32> to vector<8x8xf32>
    %186 = vector.extract_strided_slice %182 {offsets = [24, 0], sizes = [8, 8], strides = [1, 1]} : vector<64x8xf32> to vector<8x8xf32>
    %187 = vector.extract_strided_slice %182 {offsets = [32, 0], sizes = [8, 8], strides = [1, 1]} : vector<64x8xf32> to vector<8x8xf32>
    %188 = vector.extract_strided_slice %182 {offsets = [40, 0], sizes = [8, 8], strides = [1, 1]} : vector<64x8xf32> to vector<8x8xf32>
    %189 = vector.extract_strided_slice %182 {offsets = [48, 0], sizes = [8, 8], strides = [1, 1]} : vector<64x8xf32> to vector<8x8xf32>
    %190 = vector.extract_strided_slice %182 {offsets = [56, 0], sizes = [8, 8], strides = [1, 1]} : vector<64x8xf32> to vector<8x8xf32>
    %191 = tpu.concatenate %183, %184, %185, %186, %187, %188, %189, %190 in 1 : vector<8x8xf32>, vector<8x8xf32>, vector<8x8xf32>, vector<8x8xf32>, vector<8x8xf32>, vector<8x8xf32>, vector<8x8xf32>, vector<8x8xf32> -> vector<8x64xf32>
    %c0_53 = arith.constant 0 : index
    %c0_54 = arith.constant 0 : index
    %192 = vector.load %arg6[%c0_53, %c0_54] : memref<96x128xf32, #tpu.memory_space<vmem>>, vector<64x64xf32>
    %cst_55 = arith.constant dense<0.000000e+00> : vector<8x64xf32>
    %193 = tpu.matmul %191, %192, %cst_55 {dimension_numbers = #tpu.dot_dimension_numbers<[1], [0], [0], [1], [0, 0, 1, 1], [], []>} : vector<8x64xf32>, vector<64x64xf32>, vector<8x64xf32> -> vector<8x64xf32>
    %194 = arith.addf %193, %149 : vector<8x64xf32>
    %195 = vector.extract_strided_slice %2 {offsets = [8, 0], sizes = [1, 64], strides = [1, 1]} : vector<12x128xf32> to vector<1x64xf32>
    %196 = vector.extract_strided_slice %2 {offsets = [9, 0], sizes = [1, 64], strides = [1, 1]} : vector<12x128xf32> to vector<1x64xf32>
    %cst_56 = arith.constant dense<0.000000e+00> : vector<64xf32>
    %197 = vector.multi_reduction <add>, %194, %cst_56 [0] : vector<8x64xf32> to vector<64xf32>
    %198 = vector.shape_cast %197 : vector<64xf32> to vector<1x64xf32>
    %cst_57 = arith.constant 8.000000e+00 : f32
    %199 = vector.broadcast %cst_57 : f32 to vector<1x64xf32>
    %200 = arith.divf %198, %199 : vector<1x64xf32>
    %201 = vector.broadcast %200 : vector<1x64xf32> to vector<8x64xf32>
    %202 = arith.subf %194, %201 : vector<8x64xf32>
    %203 = vector.broadcast %200 : vector<1x64xf32> to vector<8x64xf32>
    %204 = arith.subf %194, %203 : vector<8x64xf32>
    %205 = arith.mulf %202, %204 : vector<8x64xf32>
    %cst_58 = arith.constant dense<0.000000e+00> : vector<64xf32>
    %206 = vector.multi_reduction <add>, %205, %cst_58 [0] : vector<8x64xf32> to vector<64xf32>
    %207 = vector.shape_cast %206 : vector<64xf32> to vector<1x64xf32>
    %cst_59 = arith.constant 8.000000e+00 : f32
    %208 = vector.broadcast %cst_59 : f32 to vector<1x64xf32>
    %209 = arith.divf %207, %208 : vector<1x64xf32>
    %210 = vector.broadcast %200 : vector<1x64xf32> to vector<8x64xf32>
    %211 = arith.subf %194, %210 : vector<8x64xf32>
    %cst_60 = arith.constant 9.99999974E-6 : f32
    %212 = vector.broadcast %cst_60 : f32 to vector<1x64xf32>
    %213 = arith.addf %209, %212 : vector<1x64xf32>
    %214 = math.rsqrt %213 : vector<1x64xf32>
    %215 = vector.broadcast %214 : vector<1x64xf32> to vector<8x64xf32>
    %216 = arith.mulf %211, %215 : vector<8x64xf32>
    %217 = vector.broadcast %195 : vector<1x64xf32> to vector<8x64xf32>
    %218 = arith.mulf %216, %217 : vector<8x64xf32>
    %219 = vector.broadcast %196 : vector<1x64xf32> to vector<8x64xf32>
    %220 = arith.addf %218, %219 : vector<8x64xf32>
    %cst_61 = arith.constant 0.000000e+00 : f32
    %221 = vector.broadcast %cst_61 : f32 to vector<8x64xf32>
    %222 = arith.maximumf %220, %221 : vector<8x64xf32>
    %c0_62 = arith.constant 0 : index
    %c64 = arith.constant 64 : index
    %223 = vector.load %arg6[%c0_62, %c64] : memref<96x128xf32, #tpu.memory_space<vmem>>, vector<64x32xf32>
    %cst_63 = arith.constant dense<0.000000e+00> : vector<8x32xf32>
    %224 = tpu.matmul %222, %223, %cst_63 {dimension_numbers = #tpu.dot_dimension_numbers<[1], [0], [0], [1], [0, 0, 1, 1], [], []>} : vector<8x64xf32>, vector<64x32xf32>, vector<8x32xf32> -> vector<8x32xf32>
    %225 = vector.extract_strided_slice %2 {offsets = [10, 0], sizes = [1, 32], strides = [1, 1]} : vector<12x128xf32> to vector<1x32xf32>
    %226 = vector.broadcast %225 : vector<1x32xf32> to vector<8x32xf32>
    %227 = arith.addf %224, %226 : vector<8x32xf32>
    %cst_64 = arith.constant 0.000000e+00 : f32
    %228 = vector.broadcast %cst_64 : f32 to vector<8x32xf32>
    %229 = arith.maximumf %227, %228 : vector<8x32xf32>
    %c64_65 = arith.constant 64 : index
    %c0_66 = arith.constant 0 : index
    %230 = vector.load %arg6[%c64_65, %c0_66] : memref<96x128xf32, #tpu.memory_space<vmem>>, vector<32x128xf32>
    %cst_67 = arith.constant dense<0.000000e+00> : vector<8x128xf32>
    %231 = tpu.matmul %229, %230, %cst_67 {dimension_numbers = #tpu.dot_dimension_numbers<[1], [0], [0], [1], [0, 0, 1, 1], [], []>} : vector<8x32xf32>, vector<32x128xf32>, vector<8x128xf32> -> vector<8x128xf32>
    %232 = vector.extract_strided_slice %2 {offsets = [11, 0], sizes = [1, 128], strides = [1, 1]} : vector<12x128xf32> to vector<1x128xf32>
    %233 = vector.broadcast %232 : vector<1x128xf32> to vector<8x128xf32>
    %234 = arith.addf %231, %233 : vector<8x128xf32>
    %c0_68 = arith.constant 0 : index
    %c0_69 = arith.constant 0 : index
    %235 = vector.load %arg8[%c0_68, %c0_69] : memref<8x128xf32, #tpu.memory_space<vmem>>, vector<8x128xf32>
    tpu.vector_store %arg8[%c0_68, %c0_69], %234 {strides = array<i32>} : memref<8x128xf32, #tpu.memory_space<vmem>>, vector<8x128xf32>,
    return
  }
}

</mosaic_0001>

<bundles_post_ra>
// kernel: bi_cross_attention.1
= control target key start
LH: loop header
LB: loop body
LE: loop exit
PB: predicated region body
PF: predicated region fallthrough
CT: control target
= control target key end

     0   :  { %13 = vsyncpa [#allocation3], 0  ;;  %s2704_s0 = inlined_call_operand.hbm [shape: f32[8,16], index: 0, kind: input, shape index: {}]   ;;  %s2705_s1 = inlined_call_operand.hbm [shape: f32[8,24], index: 1, kind: input, shape index: {}]   ;;  %s2706_s2 = inlined_call_operand.vmem [shape: f32[40,256], index: 2, kind: input, shape index: {}]   ;;  %s2707_s3 = inlined_call_operand.vmem [shape: f32[1,256], index: 3, kind: input, shape index: {}]   ;;  %s2708_s4 = inlined_call_operand.hbm [shape: f32[64,128], index: 4, kind: input, shape index: {}]   ;;  %s2709_s5 = inlined_call_operand.vmem [shape: f32[128,64], index: 5, kind: input, shape index: {}]   ;;  %s2710_s6 = inlined_call_operand.vmem [shape: f32[96,128], index: 6, kind: input, shape index: {}]   ;;  %s2711_s7 = inlined_call_operand.vmem [shape: f32[12,128], index: 7, kind: input, shape index: {}]   ;;  %s2712_s8 = inlined_call_operand.hbm [shape: f32[8,128], index: 8, kind: output, shape index: {}]  }
   0x1   :  { %14 = vsyncpa [#allocation6], 0 }
   0x2   :  { %15 = vsyncpa [#allocation4], 0  ;;  %s2256_s27 = smov [#allocation5]   ;;  %s2257_s29 = smov [#allocation2]  }
   0x3   :  { %s32_s28 = sshll.u32 %s2256_s27, 4  ;;  %s22_s30 = sshll.u32 %s2257_s29, 4  ;;  %s33_s28 = int_to_ptr.vmem [resolvable:$true] %s32_s28  ;;  %s23_s30 = int_to_ptr.vmem [resolvable:$true] %s22_s30 }
   0x4   :  { %s2162_s11 = scalar_lea.hbm %s2705_s1, 128 }
   0x5   :  { %p2163_p0 = scmp.ne.s32.totalorder %s2705_s1, %s2162_s11  ;;  %p2166_p1 = scmp.lt.u32.totalorder %s2162_s11, %s2705_s1 }
   0x7   :  { %p2168_p2 = pnand %p2166_p1, %p2163_p0 }
   0x9   :  { %2171 = shalt.err (!%p2168_p2)
}
   0xa   :  { %s2172_s16 = scalar_lea.vmem %s33_s28, 128  ;;  %p2177_p4 = scmp.lt.s32.totalorder %s33_s28, %s33_s28 }
   0xb   :  { %p2173_p3 = scmp.ne.s32.totalorder %s33_s28, %s2172_s16  ;;  %p2178_p5 = scmp.lt.s32.totalorder %s2172_s16, %s2172_s16 }
   0xd   :  { %p2179_p6 = por %p2178_p5, %p2177_p4 }
   0xf   :  { %p2180_p7 = pnand %p2179_p6, %p2173_p3 }
  0x11   :  { %2183 = shalt.err (!%p2180_p7)
}
  0x12   :  { %35 = dma.hbm_to_vmem [thread:$0]  %s2705_s1, 128, %s33_s28, [#allocation6]  }
  0x13   :  { %s2184_s21 = scalar_lea.hbm %s2704_s0, 128 }
  0x14   :  { %p2185_p8 = scmp.ne.s32.totalorder %s2704_s0, %s2184_s21  ;;  %p2188_p9 = scmp.lt.u32.totalorder %s2184_s21, %s2704_s0 }
  0x16   :  { %p2190_p10 = pnand %p2188_p9, %p2185_p8 }
  0x18   :  { %2193 = shalt.err (!%p2190_p10)
}
  0x19   :  { %s2194_s26 = scalar_lea.vmem %s23_s30, 128  ;;  %p2199_p12 = scmp.lt.s32.totalorder %s23_s30, %s23_s30 }
  0x1a   :  { %p2195_p11 = scmp.ne.s32.totalorder %s23_s30, %s2194_s26  ;;  %p2200_p13 = scmp.lt.s32.totalorder %s2194_s26, %s2194_s26 }
  0x1c   :  { %p2201_p0 = por %p2200_p13, %p2199_p12 }
  0x1e   :  { %p2202_p1 = pnand %p2201_p0, %p2195_p11 }
  0x20   :  { %2205 = shalt.err (!%p2202_p1)
}
  0x21   :  { %25 = dma.hbm_to_vmem [thread:$0]  %s2704_s0, 128, %s23_s30, [#allocation3]  }
  0x22   :  { %s2258_s28 = smov [#allocation7]   ;;  %s2206_s11 = scalar_lea.hbm %s2708_s4, 1024 }
  0x23   :  { %s45_s29 = sshll.u32 %s2258_s28, 4  ;;  %p2207_p2 = scmp.ne.s32.totalorder %s2708_s4, %s2206_s11  ;;  %s46_s29 = int_to_ptr.vmem [resolvable:$true] %s45_s29 }
  0x24   :  { %p2210_p3 = scmp.lt.u32.totalorder %s2206_s11, %s2708_s4 }
  0x26   :  { %p2212_p4 = pnand %p2210_p3, %p2207_p2 }
  0x28   :  { %2215 = shalt.err (!%p2212_p4)
}
  0x29   :  { %s2216_s16 = scalar_lea.vmem %s46_s29, 1024  ;;  %p2221_p6 = scmp.lt.s32.totalorder %s46_s29, %s46_s29 }
  0x2a   :  { %p2217_p5 = scmp.ne.s32.totalorder %s46_s29, %s2216_s16  ;;  %p2222_p7 = scmp.lt.s32.totalorder %s2216_s16, %s2216_s16 }
  0x2c   :  { %p2223_p8 = por %p2222_p7, %p2221_p6 }
  0x2e   :  { %p2224_p9 = pnand %p2223_p8, %p2217_p5 }
  0x30   :  { %2227 = shalt.err (!%p2224_p9)
}
  0x31   :  { %s2259_s0 = smov 128   ;;  %s2260_s30 = smov 8  }
  0x32   :  { %51 = dma.hbm_to_vmem [thread:$0]  %s2708_s4, 1024, %s46_s29, [#allocation6], %s2259_s0, %s2259_s0, %s2260_s30  }
  0x33   :  { %2250 = dma.done.wait [#allocation3], 128  }
  0x34   :  { %2251 = vsyncadd [#allocation3], 4294967168 }
  0x35   :  { %2252 = dma.done.wait [#allocation6], 1152  }
  0x36   :  { %2253 = vsyncadd [#allocation6], 4294966144  ;;  %v2261_v0 = vmov 0.0   ;;  %v68_v1 = vld [vmem:[#allocation5] sm:$0xff]  ;;  %v80_v3 = vld [vmem:[%s2706_s2 + $0x18] sm:$0xff]  ;;  %s2262_s23 = smov 16   ;;  %v89_v19 = vlaneseq }
  0x37   :  { %167 = vmatprep.mubr.f32.mxu0 %v2261_v0  ;;  %1894 = vmatprep.subr.mxu1 %v2261_v0  ;;  %v78_v2 = vld [vmem:[%s2706_s2 + $0x8] sm:$0xff]  ;;  %v77_v5 = vld [vmem:[%s2706_s2] sm:$0xff]  ;;  %v79_v6 = vld [vmem:[%s2706_s2 + $0x10] sm:$0xff]  ;;  %vm75_vm0 = vcmask 130048   ;;  %vm99_vm1 = vcmask 326656   ;;  %vm2263_vm2 = vmmov 0  }
  0x38   :  { %72 = vrot.lane.b32.xlu0 %v68_v1, %s2262_s23  ;;  %v2041_v4 = vpack.c.bf16 %v80_v3, %v78_v2  ;;  %v82_v7 = vld [vmem:[%s2706_s2 + $0x28] sm:$0xff]  ;;  %v2043_v8 = vpack.c.bf16 %v79_v6, %v77_v5  ;;  %v84_v9 = vld [vmem:[%s2706_s2 + $0x38] sm:$0xff]  ;;  %v81_v10 = vld [vmem:[%s2706_s2 + $0x20] sm:$0xff]  ;;  %v2391_v20 = vshrl.u32 %v89_v19, 7  ;;  %1896 = vmatprep.mubr.msk.f32.mxu1 %vm2263_vm2, %v2261_v0  ;;  %s2264_s17 = smov 64   ;;  %s2265_s18 = smov 32  }
  0x39   :  { %v83_v11 = vld [vmem:[%s2706_s2 + $0x30] sm:$0xff]  ;;  %v2045_v12 = vpack.c.bf16 %v84_v9, %v82_v7  ;;  %v86_v14 = vld [vmem:[%s2706_s2 + $0x48] sm:$0xff]  ;;  %v85_v15 = vld [vmem:[%s2706_s2 + $0x40] sm:$0xff]  ;;  %vm177_vm3 = vcmask 261120   ;;  %vm253_vm4 = vcmask 64512   ;;  %vm265_vm5 = vcmask 523520  }
  0x3a   :  { %2042 = vmatprep.subr.bf16.mxu0 %v2041_v4  ;;  %v2047_v13 = vpack.c.bf16 %v83_v11, %v81_v10  ;;  %v67_v16 = vld [vmem:[#allocation2] sm:$0xff]  ;;  %v2398_v21 = vsub.s32 1, %v2391_v20  ;;  %v2411_v27 = vsub.s32 0, %v2391_v20  ;;  %v537_v49 = vsub.s32 5, %v2391_v20  ;;  %s2266_s20 = smov 96   ;;  %s2268_s22 = smov 24  }
  0x3b   :  { %2044 = vmatpush1.bf16.msra.mxu0 %v2043_v8  ;;  %v87_v22 = vld [vmem:[%s2707_s3] sm:$0x3]  ;;  %v528_v19 = vsub.s32 4, %v2391_v20  ;;  %vm669_vm6 = vcmask 523264   ;;  %s2269_s4 = smov 40   ;;  %s2270_s24 = smov 56  }
  0x3c   :  { %2046 = vmatprep.subr.bf16.mxu0 %v2045_v12  ;;  %v96_v23 = vrot.slane %v87_v22, %v2398_v21  ;;  %v92_v28 = vrot.slane %v87_v22, %v2411_v27  ;;  %v2438_v50 = vld [vmem:[%s2711_s7] sm:$0xff]  ;;  %vm1433_vm7 = vcmask 195584   ;;  %vm1437_vm8 = vcmask 392192  }
  0x3d   :  { %v538_v51 = vrot.slane %v2438_v50, %v537_v49  ;;  %v291_v52 = vrot.slane %v2438_v50, %v2411_v27  ;;  %v300_v53 = vrot.slane %v2438_v50, %v2398_v21  ;;  %vm1439_vm9 = vcmask 457728  }
  0x3f   :  { %2048 = vmatpush1.bf16.msra.mxu0 %v2047_v13 }
  0x40   :  { %111 = vmatprep.subr.mxu0 %v86_v14 }
  0x43   :  { %112 = vmatpush1.msra.mxu0 %v85_v15 }
  0x44   :  { %1889 = vmatprep.subr.mxu0 %v2261_v0 }
  0xaa   :  { %v73_v17 = vpop.permute.xlu0 %72 }
  0xab   :  { %v76_v18 = vsel %vm75_vm0, %v67_v16, %v73_v17 }
  0xac   :  { %1762 = vmatmul.mubr.msk.f32.vlgmr.msra.gmra.mrb[0].mxu0 %vm99_vm1, %v76_v18 }
  0xad   :  { %1891 = vmatprep.mubr.msk.f32.mxu0 %vm2263_vm2, %v2261_v0 }
 0x17f   :  { %v169_v24 = vpop.f32.mrb[0].mxu0 }
 0x180   :  { %v171_v25 = vpop.f32.mrb[1].mxu0  ;;  %v170_v30 = vadd.f32 %v169_v24, %v92_v28 }
 0x181   :  { %v2404_v26 = vadd.f32 %v171_v25, %v96_v23  ;;  %v529_v25 = vrot.slane %v2438_v50, %v528_v19 }
 0x182   :  { %v266_v54 = vsel %vm265_vm5, %v170_v30, 0.0 }
 0x183   :  { %175 = vrot.lane.b32.xlu0 %v2404_v26, %s2264_s17  ;;  %v267_v55 = vrot.slane %v266_v54, 4 }
 0x185   :  { %v268_v56 = vadd.f32 %v267_v55, %v266_v54 }
 0x187   :  { %307 = vrot.lane.b32.xlu0 %v2404_v26, %s2265_s18  ;;  %v269_v57 = vrot.slane %v268_v56, 2 }
 0x189   :  { %v270_v58 = vadd.f32 %v269_v57, %v268_v56 }
 0x18b   :  { %v271_v59 = vrot.slane %v270_v58, 1 }
 0x18d   :  { %v272_v60 = vadd.f32 %v271_v59, %v270_v58  ;;  %v661_v59 = vld [vmem:[#allocation7] sm:$0xff] }
 0x18f   :  { %v274_v61 = vmul.f32 0.125, %v272_v60  ;;  %v662_v60 = vld [vmem:[#allocation7 + $0x8] sm:$0xff] }
 0x191   :  { %v275_v62 = vsub.f32 %v170_v30, %v274_v61  ;;  %v663_v61 = vld [vmem:[#allocation7 + $0x10] sm:$0xff] }
 0x193   :  { %v276_v63 = vmul.f32 %v275_v62, %v275_v62 }
 0x195   :  { %v277_v1 = vsel %vm265_vm5, %v276_v63, 0.0  ;;  %v2050_v63 = vpack.c.bf16 %v662_v60, %v661_v59 }
 0x196   :  { %v278_v2 = vrot.slane %v277_v1, 4 }
 0x198   :  { %v279_v3 = vadd.f32 %v278_v2, %v277_v1  ;;  %v664_v1 = vld [vmem:[#allocation7 + $0x18] sm:$0xff] }
 0x199   :  { %v2053_v2 = vpack.c.bf16 %v664_v1, %v663_v61 }
 0x19a   :  { %v280_v4 = vrot.slane %v279_v3, 2 }
 0x19c   :  { %v281_v5 = vadd.f32 %v280_v4, %v279_v3  ;;  %v665_v3 = vld [vmem:[#allocation7 + $0x20] sm:$0xff]  ;;  %v666_v4 = vld [vmem:[#allocation7 + $0x28] sm:$0xff] }
 0x19e   :  { %v282_v6 = vrot.slane %v281_v5, 1 }
 0x1a0   :  { %v283_v10 = vadd.f32 %v282_v6, %v281_v5  ;;  %v2056_v5 = vpack.c.bf16 %v666_v4, %v665_v3  ;;  %v667_v6 = vld [vmem:[#allocation7 + $0x30] sm:$0xff]  ;;  %v410_v3 = vsub.s32 2, %v2391_v20 }
 0x1a2   :  { %v284_v12 = vmul.f32 0.125, %v283_v10 }
 0x1a4   :  { %v285_v13 = vadd.f32 1e-05, %v284_v12 }
 0x1f5   :  { %v176_v29 = vpop.permute.xlu0 %175 }
 0x1f6   :  { %1890 = vmatpush3.xpose.msk.msra.mxu0 %vm177_vm3, %v176_v29 }
 0x1f7   :  { %1904 = vmatprep.subr.mxu0 %v2261_v0 }
 0x1f9   :  { %v308_v31 = vpop.permute.xlu0 %307  ;;  %1892 = vmatmul.mubr.msk.f32.vlgmr.msra.gmra.mrb[2].mxu0 %vm177_vm3, %v170_v30 }
 0x1fa   :  { %1895 = vmatpush3.msra.mxu1 %v308_v31  ;;  %1906 = vmatprep.mubr.msk.f32.mxu0 %vm2263_vm2, %v2261_v0 }
 0x1fb   :  { %1899 = vmatprep.subr.mxu1 %v2261_v0 }
 0x2cc   :  { %v249_v32 = vpop.f32.mrb[2].mxu0 }
 0x2cd   :  { %v1893_v33 = vpop.f32.mrb[3].mxu0  ;;  %v254_v34 = vsel %vm253_vm4, %v249_v32, -inf }
 0x2ce   :  { %255 = vmax.xlane.f32.xlu1 %v254_v34 }
 0x35b   :  { %v256_v35 = vpop.xlane.xlu1 %255 }
 0x35c   :  { %v257_v36 = vsub.f32 %v249_v32, %v256_v35 }
 0x35e   :  { %v258_v37 = vmul.f32 1.442695, %v257_v36 }
 0x360   :  { %2136 = vpow2.f32 %v258_v37 }
 0x36a   :  { %v2137_v38 = vpop.eup %2136 }
 0x36b   :  { %v260_v39 = vsel %vm253_vm4, %v2137_v38, 0.0 }
 0x36c   :  { %261 = vadd.xlane.f32.xlu1 %v260_v39 }
 0x37d   :  { %418 = vrot.lane.b32.xlu1 %v170_v30, %s2264_s17 }
 0x3f9   :  { %v262_v40 = vpop.xlane.xlu1 %261 }
 0x3fa   :  { %2138 = vrcp.f32 %v262_v40 }
 0x3fd   :  { %v419_v43 = vpop.permute.xlu1 %418 }
 0x404   :  { %v2139_v41 = vpop.eup %2138 }
 0x405   :  { %v264_v42 = vmul.f32 %v2139_v41, %v2137_v38 }
 0x407   :  { %1897 = vmatmul.mubr.msk.f32.vlgmr.msra.gmra.mrb[0].mxu1 %vm253_vm4, %v264_v42 }
 0x408   :  { %1900 = vmatpush3.xpose.msk.msra.mxu1 %vm177_vm3, %v419_v43  ;;  %1901 = vmatprep.mubr.msk.f32.mxu1 %vm2263_vm2, %v2261_v0 }
 0x40b   :  { %1902 = vmatmul.mubr.msk.f32.vlgmr.msra.gmra.mrb[2].mxu1 %vm177_vm3, %v2404_v26 }
 0x40c   :  { %1925 = vmatprep.mubr.msk.f32.mxu1 %vm2263_vm2, %v2261_v0 }
 0x4da   :  { %v2431_v44 = vpop.f32.mrb[0].mxu1 }
 0x4db   :  { %v1898_v45 = vpop.f32.mrb[1].mxu1 }
 0x4de   :  { %v490_v46 = vpop.f32.mrb[2].mxu1 }
 0x4df   :  { %v1903_v47 = vpop.f32.mrb[3].mxu1  ;;  %v494_v48 = vsel %vm253_vm4, %v490_v46, -inf }
 0x4e0   :  { %495 = vmax.xlane.f32.xlu0 %v494_v48 }
 0x4f6   :  { %545 = vrot.lane.b32.xlu0 %v170_v30, %s2265_s18  ;;  %v505_v30 = vsel %vm265_vm5, %v2404_v26, 0.0 }
 0x4f7   :  { %v506_v31 = vrot.slane %v505_v30, 4 }
 0x4f9   :  { %v507_v32 = vadd.f32 %v506_v31, %v505_v30 }
 0x4fa   :  { %540 = vrot.lane.b32.xlu0 %v538_v51, %s2265_s18 }
 0x4fb   :  { %v508_v33 = vrot.slane %v507_v32, 2 }
 0x4fd   :  { %v509_v34 = vadd.f32 %v508_v33, %v507_v32 }
 0x4fe   :  { %293 = vrot.lane.b32.xlu0 %v291_v52, %s2265_s18 }
 0x4ff   :  { %v510_v35 = vrot.slane %v509_v34, 1 }
 0x501   :  { %v511_v36 = vadd.f32 %v510_v35, %v509_v34 }
 0x502   :  { %302 = vrot.lane.b32.xlu0 %v300_v53, %s2265_s18 }
 0x503   :  { %v512_v37 = vmul.f32 0.125, %v511_v36  ;;  %v648_v36 = vsub.s32 6, %v2391_v20 }
 0x505   :  { %v513_v38 = vsub.f32 %v2404_v26, %v512_v37  ;;  %v653_v37 = vsub.s32 7, %v2391_v20 }
 0x507   :  { %v514_v39 = vmul.f32 %v513_v38, %v513_v38 }
 0x509   :  { %v515_v40 = vsel %vm265_vm5, %v514_v39, 0.0 }
 0x50a   :  { %v516_v41 = vrot.slane %v515_v40, 4 }
 0x50c   :  { %v517_v42 = vadd.f32 %v516_v41, %v515_v40  ;;  %v654_v41 = vrot.slane %v2438_v50, %v653_v37 }
 0x50e   :  { %v518_v43 = vrot.slane %v517_v42, 2 }
 0x510   :  { %v519_v45 = vadd.f32 %v518_v43, %v517_v42 }
 0x56d   :  { %v496_v7 = vpop.xlane.xlu0 %495 }
 0x56e   :  { %v497_v8 = vsub.f32 %v490_v46, %v496_v7  ;;  %v520_v46 = vrot.slane %v519_v45, 1  ;;  %v668_v7 = vld [vmem:[#allocation7 + $0x38] sm:$0xff] }
 0x570   :  { %v498_v9 = vmul.f32 1.442695, %v497_v8  ;;  %v521_v47 = vadd.f32 %v520_v46, %v519_v45  ;;  %v2059_v8 = vpack.c.bf16 %v668_v7, %v667_v6  ;;  %v415_v7 = vsub.s32 3, %v2391_v20 }
 0x571   :  { %v546_v11 = vpop.permute.xlu0 %545 }
 0x572   :  { %2140 = vpow2.f32 %v498_v9  ;;  %1905 = vmatpush3.msra.mxu0 %v546_v11  ;;  %v522_v48 = vmul.f32 0.125, %v521_v47 }
 0x573   :  { %2142 = vrsqrt.f32 %v285_v13 }
 0x574   :  { %v523_v49 = vadd.f32 1e-05, %v522_v48 }
 0x575   :  { %v541_v16 = vpop.permute.xlu0 %540 }
 0x576   :  { %2144 = vrsqrt.f32 %v523_v49 }
 0x579   :  { %v294_v17 = vpop.permute.xlu0 %293 }
 0x57c   :  { %v2141_v14 = vpop.eup %2140 }
 0x57d   :  { %v500_v15 = vsel %vm253_vm4, %v2141_v14, 0.0  ;;  %v2143_v18 = vpop.eup %2142  ;;  %v303_v23 = vpop.permute.xlu0 %302 }
 0x57e   :  { %501 = vadd.xlane.f32.xlu1 %v500_v15  ;;  %v287_v22 = vmul.f32 %v2143_v18, %v275_v62  ;;  %v2267_v62 = vmov 0.0|0.0  }
 0x57f   :  { %2049 = vmatprep.subr.bf16.mxu1 %v2267_v62 }
 0x580   :  { %v296_v24 = vmul.f32 %v294_v17, %v287_v22  ;;  %v2145_v51 = vpop.eup %2144  ;;  %2051 = vmatpush3.bf16.msra.mxu1 %v2050_v63 }
 0x581   :  { %v525_v53 = vmul.f32 %v2145_v51, %v513_v38  ;;  %2052 = vmatprep.subr.bf16.mxu1 %v2267_v62  ;;  %v649_v38 = vrot.slane %v2438_v50, %v648_v36 }
 0x582   :  { %v305_v28 = vadd.f32 %v303_v23, %v296_v24 }
 0x584   :  { %v306_v29 = vmax.f32 %v305_v28, 0.0  ;;  %2054 = vmatpush3.bf16.msra.mxu1 %v2053_v2 }
 0x585   :  { %2055 = vmatprep.subr.bf16.mxu1 %v2267_v62 }
 0x588   :  { %2057 = vmatpush3.bf16.msra.mxu1 %v2056_v5  ;;  %v411_v5 = vrot.slane %v2438_v50, %v410_v3 }
 0x589   :  { %2058 = vmatprep.subr.bf16.mxu1 %v2267_v62 }
 0x58c   :  { %2060 = vmatpush3.bf16.msra.mxu1 %v2059_v8 }
 0x58d   :  { %1954 = vmatprep.subr.mxu1 %v2261_v0 }
 0x58f   :  { %531 = vrot.lane.b32.xlu1 %v529_v25, %s2265_s18 }
 0x593   :  { %311 = vrot.lane.b32.xlu1 %v306_v29, %s2266_s20 }
 0x60b   :  { %v502_v52 = vpop.xlane.xlu1 %501 }
 0x60c   :  { %2146 = vrcp.f32 %v502_v52 }
 0x60f   :  { %v532_v54 = vpop.permute.xlu1 %531 }
 0x610   :  { %v534_v55 = vmul.f32 %v532_v54, %v525_v53 }
 0x612   :  { %v543_v56 = vadd.f32 %v541_v16, %v534_v55 }
 0x613   :  { %v312_v45 = vpop.permute.xlu1 %311 }
 0x614   :  { %v544_v26 = vmax.f32 %v543_v56, 0.0  ;;  %v384_v46 = vadd.f32 %v2431_v44, %v312_v45 }
 0x616   :  { %v2147_v57 = vpop.eup %2146  ;;  %549 = vrot.lane.b32.xlu0 %v544_v26, %s2266_s20  ;;  %v387_v47 = vsel %vm177_vm3, %v384_v46, 0.0 }
 0x617   :  { %v504_v58 = vmul.f32 %v2147_v57, %v2141_v14  ;;  %v388_v48 = vrot.slane %v387_v47, 4 }
 0x619   :  { %1907 = vmatmul.mubr.msk.f32.vlgmr.msra.gmra.mrb[4].mxu0 %vm253_vm4, %v504_v58  ;;  %v389_v49 = vadd.f32 %v388_v48, %v387_v47 }
 0x61b   :  { %v390_v51 = vrot.slane %v389_v49, 2 }
 0x61d   :  { %v391_v52 = vadd.f32 %v390_v51, %v389_v49 }
 0x61f   :  { %v392_v53 = vrot.slane %v391_v52, 1 }
 0x621   :  { %v393_v54 = vadd.f32 %v392_v53, %v391_v52 }
 0x623   :  { %v394_v55 = vmul.f32 0.125, %v393_v54 }
 0x625   :  { %v395_v56 = vsub.f32 %v384_v46, %v394_v55 }
 0x627   :  { %v396_v26 = vmul.f32 %v395_v56, %v395_v56 }
 0x629   :  { %v397_v57 = vsel %vm177_vm3, %v396_v26, 0.0 }
 0x62a   :  { %v398_v58 = vrot.slane %v397_v57, 4 }
 0x62c   :  { %v399_v59 = vadd.f32 %v398_v58, %v397_v57 }
 0x62e   :  { %v400_v60 = vrot.slane %v399_v59, 2 }
 0x630   :  { %v401_v61 = vadd.f32 %v400_v60, %v399_v59 }
 0x632   :  { %v402_v63 = vrot.slane %v401_v61, 1 }
 0x634   :  { %v403_v1 = vadd.f32 %v402_v63, %v401_v61 }
 0x636   :  { %v404_v44 = vmul.f32 0.125, %v403_v1 }
 0x638   :  { %v405_v2 = vadd.f32 1e-05, %v404_v44 }
 0x688   :  { %v550_v9 = vpop.permute.xlu0 %549 }
 0x6ec   :  { %v621_v10 = vpop.f32.mrb[4].mxu0 }
 0x6ed   :  { %v622_v11 = vadd.f32 %v621_v10, %v550_v9  ;;  %v1908_v12 = vpop.f32.mrb[5].mxu0  ;;  %v416_v9 = vrot.slane %v2438_v50, %v415_v7  ;;  %v743_v50 = vld [vmem:[%s2709_s5] sm:$0xff] }
 0x6ee   :  { %1930 = vmatprep.mubr.msk.f32.mxu0 %vm669_vm6, %v743_v50 }
 0x6ef   :  { %v625_v13 = vsel %vm177_vm3, %v622_v11, 0.0 }
 0x6f0   :  { %v626_v14 = vrot.slane %v625_v13, 4 }
 0x6f2   :  { %v627_v15 = vadd.f32 %v626_v14, %v625_v13  ;;  %v744_v13 = vld [vmem:[%s2709_s5 + $0x8] sm:$0xff]  ;;  %v745_v14 = vld [vmem:[%s2709_s5 + $0x10] sm:$0xff] }
 0x6f4   :  { %v628_v16 = vrot.slane %v627_v15, 2 }
 0x6f6   :  { %v629_v17 = vadd.f32 %v628_v16, %v627_v15  ;;  %v746_v15 = vld [vmem:[%s2709_s5 + $0x18] sm:$0xff]  ;;  %v747_v16 = vld [vmem:[%s2709_s5 + $0x20] sm:$0xff] }
 0x6f8   :  { %v630_v18 = vrot.slane %v629_v17, 1 }
 0x6fa   :  { %v631_v19 = vadd.f32 %v630_v18, %v629_v17  ;;  %v748_v17 = vld [vmem:[%s2709_s5 + $0x28] sm:$0xff] }
 0x6fc   :  { %v632_v22 = vmul.f32 0.125, %v631_v19  ;;  %v749_v19 = vld [vmem:[%s2709_s5 + $0x30] sm:$0xff] }
 0x6fe   :  { %v633_v23 = vsub.f32 %v622_v11, %v632_v22 }
 0x700   :  { %v634_v24 = vmul.f32 %v633_v23, %v633_v23 }
 0x702   :  { %v635_v25 = vsel %vm177_vm3, %v634_v24, 0.0  ;;  %v751_v24 = vld [vmem:[%s2709_s5 + $0x40] sm:$0xff] }
 0x703   :  { %v636_v28 = vrot.slane %v635_v25, 4 }
 0x705   :  { %v637_v29 = vadd.f32 %v636_v28, %v635_v25  ;;  %v752_v25 = vld [vmem:[%s2709_s5 + $0x48] sm:$0xff]  ;;  %v753_v28 = vld [vmem:[%s2709_s5 + $0x50] sm:$0xff] }
 0x707   :  { %v638_v30 = vrot.slane %v637_v29, 2 }
 0x709   :  { %v639_v31 = vadd.f32 %v638_v30, %v637_v29  ;;  %v754_v29 = vld [vmem:[%s2709_s5 + $0x58] sm:$0xff]  ;;  %v755_v30 = vld [vmem:[%s2709_s5 + $0x60] sm:$0xff] }
 0x70b   :  { %v640_v32 = vrot.slane %v639_v31, 1 }
 0x70d   :  { %v641_v33 = vadd.f32 %v640_v32, %v639_v31  ;;  %v756_v31 = vld [vmem:[%s2709_s5 + $0x68] sm:$0xff]  ;;  %v757_v32 = vld [vmem:[%s2709_s5 + $0x70] sm:$0xff] }
 0x70f   :  { %v642_v34 = vmul.f32 0.125, %v641_v33  ;;  %v758_v33 = vld [vmem:[%s2709_s5 + $0x78] sm:$0xff] }
 0x711   :  { %v643_v35 = vadd.f32 1e-05, %v642_v34 }
 0x713   :  { %2148 = vrsqrt.f32 %v643_v35 }
 0x714   :  { %2150 = vrsqrt.f32 %v405_v2 }
 0x71d   :  { %v2149_v39 = vpop.eup %2148 }
 0x71e   :  { %v645_v40 = vmul.f32 %v2149_v39, %v633_v23  ;;  %v2151_v4 = vpop.eup %2150  ;;  %v750_v23 = vld [vmem:[%s2709_s5 + $0x38] sm:$0xff] }
 0x71f   :  { %v407_v6 = vmul.f32 %v2151_v4, %v395_v56 }
 0x720   :  { %v650_v42 = vmul.f32 %v649_v38, %v645_v40 }
 0x721   :  { %v412_v8 = vmul.f32 %v411_v5, %v407_v6 }
 0x722   :  { %v655_v43 = vadd.f32 %v654_v41, %v650_v42 }
 0x723   :  { %v417_v10 = vadd.f32 %v416_v9, %v412_v8 }
 0x724   :  { %657 = vrot.lane.b32.xlu0 %v655_v43, %s2265_s18 }
 0x796   :  { %v658_v11 = vpop.permute.xlu0 %657 }
 0x797   :  { %v2486_v12 = vsel %vm177_vm3, %v417_v10, %v658_v11 }
 0x798   :  { %1926 = vmatmul.mubr.msk.f32.vlgmr.msra.gmra.mrb[4].mxu1 %vm669_vm6, %v2486_v12  ;;  %1928 = vmatprep.subr.msk.mxu0 %vm669_vm6, %v2486_v12 }
 0x799   :  { %1929 = vmatpush3.xpose.msk.msra.mxu0 %vm669_vm6, %v2486_v12  ;;  %1956 = vmatprep.mubr.msk.f32.mxu1 %vm2263_vm2, %v2261_v0 }
 0x79a   :  { %2061 = vmatprep.subr.bf16.mxu0 %v2267_v62 }
 0x79c   :  { %1931 = vmatmul.mubr.msk.f32.vlgmr.msra.gmra.mrb[6].mxu0 %vm669_vm6, %v744_v13 }
 0x79d   :  { %1933 = vmatprep.mubr.msk.f32.mxu0 %vm669_vm6, %v745_v14 }
 0x7a0   :  { %1934 = vmatmul.mubr.msk.f32.gmra.mrb[8].mxu0 %vm669_vm6, %v746_v15 }
 0x7a1   :  { %1936 = vmatprep.mubr.msk.f32.mxu0 %vm669_vm6, %v747_v16 }
 0x7a4   :  { %1937 = vmatmul.mubr.msk.f32.gmra.mrb[10].mxu0 %vm669_vm6, %v748_v17 }
 0x7a5   :  { %1939 = vmatprep.mubr.msk.f32.mxu0 %vm669_vm6, %v749_v19 }
 0x7a8   :  { %1940 = vmatmul.mubr.msk.f32.gmra.mrb[12].mxu0 %vm669_vm6, %v750_v23 }
 0x7a9   :  { %1942 = vmatprep.mubr.msk.f32.mxu0 %vm669_vm6, %v751_v24 }
 0x7ac   :  { %1943 = vmatmul.mubr.msk.f32.gmra.mrb[14].mxu0 %vm669_vm6, %v752_v25 }
 0x7ad   :  { %1945 = vmatprep.mubr.msk.f32.mxu0 %vm669_vm6, %v753_v28 }
 0x7b0   :  { %1946 = vmatmul.mubr.msk.f32.gmra.mrb[16].mxu0 %vm669_vm6, %v754_v29 }
 0x7b1   :  { %1948 = vmatprep.mubr.msk.f32.mxu0 %vm669_vm6, %v755_v30 }
 0x7b4   :  { %1949 = vmatmul.mubr.msk.f32.gmra.mrb[18].mxu0 %vm669_vm6, %v756_v31 }
 0x7b5   :  { %1951 = vmatprep.mubr.msk.f32.mxu0 %vm669_vm6, %v757_v32 }
 0x7b8   :  { %1952 = vmatmul.mubr.msk.f32.gmra.mrb[20].mxu0 %vm669_vm6, %v758_v33 }
 0x7b9   :  { %2008 = vmatprep.mubr.msk.f32.mxu0 %vm2263_vm2, %v2261_v0 }
 0x86b   :  { %v739_v18 = vpop.f32.mrb[4].mxu1 }
 0x86c   :  { %1050 = vrot.lane.b32.xlu0 %v739_v18, %s2266_s20  ;;  %953 = vrot.lane.b32.xlu1 %v739_v18, %s2264_s17  ;;  %v1927_v22 = vpop.f32.mrb[5].mxu1 }
 0x86d   :  { %1955 = vmatpush3.xpose.msk.msra.mxu1 %vm177_vm3, %v739_v18 }
 0x86e   :  { %1959 = vmatprep.subr.mxu1 %v2261_v0 }
 0x86f   :  { %v2573_v37 = vpop.f32.mrb[6].mxu0 }
 0x870   :  { %1048 = vrot.lane.b32.xlu1 %v739_v18, %s2265_s18  ;;  %v2575_v38 = vpop.f32.mrb[7].mxu0 }
 0x873   :  { %v2577_v39 = vpop.f32.mrb[8].mxu0 }
 0x874   :  { %v2579_v40 = vpop.f32.mrb[9].mxu0 }
 0x877   :  { %v2581_v41 = vpop.f32.mrb[10].mxu0 }
 0x878   :  { %v2583_v42 = vpop.f32.mrb[11].mxu0 }
 0x87b   :  { %v2585_v43 = vpop.f32.mrb[12].mxu0 }
 0x87c   :  { %v2587_v45 = vpop.f32.mrb[13].mxu0 }
 0x87f   :  { %v1944_v46 = vpop.f32.mrb[14].mxu0 }
 0x880   :  { %v913_v47 = vpop.f32.mrb[15].mxu0 }
 0x883   :  { %v1947_v48 = vpop.f32.mrb[16].mxu0 }
 0x884   :  { %v923_v49 = vpop.f32.mrb[17].mxu0 }
 0x887   :  { %v1950_v51 = vpop.f32.mrb[18].mxu0 }
 0x888   :  { %v933_v52 = vpop.f32.mrb[19].mxu0 }
 0x88b   :  { %v1953_v53 = vpop.f32.mrb[20].mxu0 }
 0x88c   :  { %v943_v54 = vpop.f32.mrb[21].mxu0 }
 0x8de   :  { %v1051_v34 = vpop.permute.xlu0 %1050  ;;  %v954_v35 = vpop.permute.xlu1 %953 }
 0x8df   :  { %1957 = vmatmul.mubr.msk.f32.vlgmr.msra.gmra.mrb[6].mxu1 %vm177_vm3, %v954_v35 }
 0x8e0   :  { %1960 = vmatpush3.xpose.msk.msra.mxu1 %vm177_vm3, %v1051_v34  ;;  %1961 = vmatprep.mubr.msk.f32.mxu1 %vm2263_vm2, %v2261_v0 }
 0x8e2   :  { %v1049_v36 = vpop.permute.xlu1 %1048 }
 0x8e3   :  { %1962 = vmatmul.mubr.msk.f32.vlgmr.msra.gmra.mrb[8].mxu1 %vm177_vm3, %v1049_v36 }
 0x8e4   :  { %1966 = vmatprep.mubr.msk.f32.mxu1 %vm253_vm4, %v913_v47 }
 0x9b2   :  { %v1025_v55 = vpop.f32.mrb[6].mxu1 }
 0x9b3   :  { %v1029_v56 = vsel %vm253_vm4, %v1025_v55, -inf  ;;  %v1958_v26 = vpop.f32.mrb[7].mxu1 }
 0x9b4   :  { %v1030_v57 = vrot.slane %v1029_v56, 4 }
 0x9b6   :  { %v1031_v58 = vmax.f32 %v1029_v56, %v1030_v57  ;;  %v1122_v59 = vpop.f32.mrb[8].mxu1 }
 0x9b7   :  { %v1126_v60 = vsel %vm253_vm4, %v1122_v59, -inf  ;;  %v1963_v61 = vpop.f32.mrb[9].mxu1 }
 0x9b8   :  { %v1032_v63 = vrot.slane %v1031_v58, 2  ;;  %v1127_v1 = vrot.slane %v1126_v60, 4 }
 0x9ba   :  { %v1033_v44 = vmax.f32 %v1031_v58, %v1032_v63  ;;  %v1128_v2 = vmax.f32 %v1126_v60, %v1127_v1 }
 0x9bc   :  { %v1034_v4 = vrot.slane %v1033_v44, 1  ;;  %v1129_v5 = vrot.slane %v1128_v2, 2 }
 0x9be   :  { %v1035_v6 = vmax.f32 %v1033_v44, %v1034_v4  ;;  %v1130_v8 = vmax.f32 %v1128_v2, %v1129_v5 }
 0x9c0   :  { %v1036_v9 = vsub.f32 %v1025_v55, %v1035_v6  ;;  %v1131_v10 = vrot.slane %v1130_v8, 1 }
 0x9c2   :  { %v1037_v11 = vmul.f32 1.442695, %v1036_v9  ;;  %v1132_v50 = vmax.f32 %v1130_v8, %v1131_v10 }
 0x9c4   :  { %2152 = vpow2.f32 %v1037_v11  ;;  %v1133_v13 = vsub.f32 %v1122_v59, %v1132_v50 }
 0x9c6   :  { %v1134_v14 = vmul.f32 1.442695, %v1133_v13 }
 0x9c8   :  { %2154 = vpow2.f32 %v1134_v14 }
 0x9ce   :  { %v2153_v15 = vpop.eup %2152 }
 0x9cf   :  { %v1039_v16 = vsel %vm253_vm4, %v2153_v15, 0.0 }
 0x9d0   :  { %v1040_v17 = vrot.slane %v1039_v16, 4 }
 0x9d2   :  { %v2155_v18 = vpop.eup %2154  ;;  %v1041_v19 = vadd.f32 %v1040_v17, %v1039_v16 }
 0x9d3   :  { %v1136_v22 = vsel %vm253_vm4, %v2155_v18, 0.0 }
 0x9d4   :  { %v1042_v23 = vrot.slane %v1041_v19, 2  ;;  %v1137_v24 = vrot.slane %v1136_v22, 4 }
 0x9d6   :  { %v1043_v25 = vadd.f32 %v1042_v23, %v1041_v19  ;;  %v1138_v28 = vadd.f32 %v1137_v24, %v1136_v22 }
 0x9d8   :  { %v1139_v29 = vrot.slane %v1138_v28, 2  ;;  %v1044_v30 = vrot.slane %v1043_v25, 1 }
 0x9da   :  { %v1140_v31 = vadd.f32 %v1139_v29, %v1138_v28  ;;  %v1045_v32 = vadd.f32 %v1044_v30, %v1043_v25 }
 0x9dc   :  { %v1141_v33 = vrot.slane %v1140_v31, 1  ;;  %2156 = vrcp.f32 %v1045_v32 }
 0x9de   :  { %v1142_v34 = vadd.f32 %v1141_v33, %v1140_v31 }
 0x9e0   :  { %2158 = vrcp.f32 %v1142_v34 }
 0x9e6   :  { %v2157_v35 = vpop.eup %2156 }
 0x9e7   :  { %v1047_v55 = vmul.f32 %v2157_v35, %v2153_v15 }
 0x9ea   :  { %v2159_v36 = vpop.eup %2158 }
 0x9eb   :  { %v1144_v47 = vmul.f32 %v2159_v36, %v2155_v18  ;;  %v1664_v36 = vld [vmem:[%s2710_s6 + $0x40] sm:$0xff] }
 0x9ed   :  { %1964 = vmatprep.subr.mxu1 %v1144_v47 }
 0x9ee   :  { %1965 = vmatpush3.msra.mxu1 %v1144_v47  ;;  %v1665_v47 = vld [vmem:[%s2710_s6 + $0x48] sm:$0xff] }
 0x9ef   :  { %1967 = vmatmul.mubr.msk.f32.vlgmr.msra.gmra.mrb[10].mxu1 %vm253_vm4, %v1944_v46  ;;  %1978 = vmatprep.subr.mxu1 %v1047_v55 }
 0x9f0   :  { %1979 = vmatpush3.msra.mxu1 %v1047_v55  ;;  %1969 = vmatprep.mubr.msk.f32.mxu1 %vm253_vm4, %v923_v49  ;;  %v1448_v49 = vld [vmem:[%s2710_s6 + $0x38] sm:$0xff]  ;;  %v2086_v55 = vpack.c.bf16 %v1665_v47, %v1664_v36 }
 0x9f1   :  { %2085 = vmatprep.subr.bf16.mxu1 %v2267_v62 }
 0x9f3   :  { %1970 = vmatmul.mubr.msk.f32.gmra.mrb[12].mxu1 %vm253_vm4, %v1947_v48  ;;  %v1447_v48 = vld [vmem:[%s2710_s6 + $0x30] sm:$0xff] }
 0x9f4   :  { %1972 = vmatprep.mubr.msk.f32.mxu1 %vm253_vm4, %v933_v52  ;;  %v2131_v63 = vpack.i.bf16 %v1448_v49, %v1447_v48 }
 0x9f7   :  { %1973 = vmatmul.mubr.msk.f32.gmra.mrb[14].mxu1 %vm253_vm4, %v1950_v51  ;;  %v2071_v51 = vpack.c.bf16 %v1448_v49, %v1447_v48 }
 0x9f8   :  { %1975 = vmatprep.mubr.msk.f32.mxu1 %vm253_vm4, %v943_v54 }
 0x9fb   :  { %1976 = vmatmul.mubr.msk.f32.gmra.mrb[16].mxu1 %vm253_vm4, %v1953_v53 }
 0x9fc   :  { %1980 = vmatprep.mubr.msk.f32.mxu1 %vm253_vm4, %v2575_v38  ;;  %v1442_v38 = vld [vmem:[%s2710_s6 + $0x8] sm:$0xff] }
 0x9ff   :  { %1981 = vmatmul.mubr.msk.f32.vlgmr.msra.gmra.mrb[10].mxu1 %vm253_vm4, %v2573_v37  ;;  %v1441_v37 = vld [vmem:[%s2710_s6] sm:$0xff] }
 0xa00   :  { %1983 = vmatprep.mubr.msk.f32.mxu1 %vm253_vm4, %v2579_v40  ;;  %v2062_v40 = vpack.c.bf16 %v1442_v38, %v1441_v37  ;;  %v2116_v61 = vpack.i.bf16 %v1442_v38, %v1441_v37  ;;  %2087 = vmatpush3.bf16.msra.mxu1 %v2086_v55 }
 0xa01   :  { %2088 = vmatprep.subr.bf16.mxu1 %v2267_v62 }
 0xa02   :  { %2063 = vmatpush3.bf16.msra.mxu0 %v2062_v40 }
 0xa03   :  { %1984 = vmatmul.mubr.msk.f32.gmra.mrb[12].mxu1 %vm253_vm4, %v2577_v39  ;;  %v1443_v39 = vld [vmem:[%s2710_s6 + $0x10] sm:$0xff]  ;;  %2064 = vmatprep.subr.bf16.mxu0 %v2267_v62 }
 0xa04   :  { %1986 = vmatprep.mubr.msk.f32.mxu1 %vm253_vm4, %v2583_v42 }
 0xa07   :  { %1987 = vmatmul.mubr.msk.f32.gmra.mrb[14].mxu1 %vm253_vm4, %v2581_v41  ;;  %v1444_v41 = vld [vmem:[%s2710_s6 + $0x18] sm:$0xff] }
 0xa08   :  { %1989 = vmatprep.mubr.msk.f32.mxu1 %vm253_vm4, %v2587_v45  ;;  %v2065_v42 = vpack.c.bf16 %v1444_v41, %v1443_v39  ;;  %v1446_v45 = vld [vmem:[%s2710_s6 + $0x28] sm:$0xff]  ;;  %v2121_v60 = vpack.i.bf16 %v1444_v41, %v1443_v39 }
 0xa0a   :  { %2066 = vmatpush3.bf16.msra.mxu0 %v2065_v42 }
 0xa0b   :  { %1990 = vmatmul.mubr.msk.f32.gmra.mrb[16].mxu1 %vm253_vm4, %v2585_v43  ;;  %2067 = vmatprep.subr.bf16.mxu0 %v2267_v62  ;;  %v1445_v43 = vld [vmem:[%s2710_s6 + $0x20] sm:$0xff] }
 0xa0c   :  { %2038 = vmatprep.mubr.msk.f32.mxu1 %vm2263_vm2, %v2261_v0  ;;  %v2068_v46 = vpack.c.bf16 %v1446_v45, %v1445_v43  ;;  %v2126_v1 = vpack.i.bf16 %v1446_v45, %v1445_v43 }
 0xa0e   :  { %2069 = vmatpush3.bf16.msra.mxu0 %v2068_v46 }
 0xa0f   :  { %2070 = vmatprep.subr.bf16.mxu0 %v2267_v62 }
 0xa12   :  { %2072 = vmatpush3.bf16.msra.mxu0 %v2071_v51 }
 0xa13   :  { %2073 = vmatprep.subr.bf16.mxu0 %v2267_v62 }
 0xad2   :  { %v1982_v52 = vpop.f32.mrb[10].mxu1 }
 0xad3   :  { %1404 = vrot.lane.b32.xlu0 %v1982_v52, %s2260_s30  ;;  %v1364_v53 = vpop.f32.mrb[11].mxu1  ;;  %s2271_s30 = smov 48  }
 0xad6   :  { %v1985_v54 = vpop.f32.mrb[12].mxu1 }
 0xad7   :  { %1412 = vrot.lane.b32.xlu0 %v1985_v54, %s2268_s22  ;;  %v1374_v56 = vpop.f32.mrb[13].mxu1 }
 0xad8   :  { %1408 = vrot.lane.b32.xlu1 %v1374_v56, %s2262_s23 }
 0xada   :  { %v1988_v26 = vpop.f32.mrb[14].mxu1 }
 0xadb   :  { %1420 = vrot.lane.b32.xlu0 %v1988_v26, %s2269_s4  ;;  %v1384_v57 = vpop.f32.mrb[15].mxu1 }
 0xadc   :  { %1416 = vrot.lane.b32.xlu1 %v1384_v57, %s2265_s18 }
 0xade   :  { %v1991_v58 = vpop.f32.mrb[16].mxu1 }
 0xadf   :  { %1428 = vrot.lane.b32.xlu0 %v1991_v58, %s2270_s24  ;;  %v1394_v59 = vpop.f32.mrb[17].mxu1 }
 0xae0   :  { %1424 = vrot.lane.b32.xlu1 %v1394_v59, %s2271_s30 }
 0xae3   :  { %2122 = vrot.lane.b32.xlu0 %v2121_v60, %s2264_s17  ;;  %v70_v60 = vld [vmem:[%s2711_s7 + $0x8] sm:$0xf]  ;;  %s2272_s7 = smov [#allocation8]  }
 0xae4   :  { %2117 = vrot.lane.b32.xlu1 %v2116_v61, %s2264_s17  ;;  %v1546_v61 = vrot.slane %v70_v60, %v2411_v27  ;;  %v1557_v27 = vrot.slane %v70_v60, %v410_v3  ;;  %s1752_s9 = sshll.u32 %s2272_s7, 4  ;;  %s1753_s9 = int_to_ptr.vmem [resolvable:$true] %s1752_s9 }
 0xae5   :  { %p2233_p11 = scmp.lt.s32.totalorder %s1753_s9, %s1753_s9 }
 0xae7   :  { %2132 = vrot.lane.b32.xlu0 %v2131_v63, %s2264_s17 }
 0xae8   :  { %2127 = vrot.lane.b32.xlu1 %v2126_v1, %s2264_s17 }
 0xb45   :  { %v1405_v44 = vpop.permute.xlu0 %1404 }
 0xb46   :  { %v1431_v4 = vsel %vm253_vm4, %v1364_v53, %v1405_v44  ;;  %v1551_v44 = vrot.slane %v70_v60, %v2398_v21 }
 0xb49   :  { %v1413_v2 = vpop.permute.xlu0 %1412 }
 0xb4a   :  { %v1409_v5 = vpop.permute.xlu1 %1408 }
 0xb4b   :  { %v1432_v6 = vsel %vm75_vm0, %v1431_v4, %v1409_v5 }
 0xb4c   :  { %v1434_v9 = vsel %vm1433_vm7, %v1432_v6, %v1413_v2  ;;  %v1666_v6 = vld [vmem:[%s2710_s6 + $0x50] sm:$0xff] }
 0xb4d   :  { %v1421_v8 = vpop.permute.xlu0 %1420 }
 0xb4e   :  { %v1417_v10 = vpop.permute.xlu1 %1416 }
 0xb4f   :  { %v1435_v11 = vsel %vm177_vm3, %v1434_v9, %v1417_v10 }
 0xb50   :  { %v1436_v50 = vsel %vm99_vm1, %v1435_v11, %v1421_v8  ;;  %v1667_v8 = vld [vmem:[%s2710_s6 + $0x58] sm:$0xff]  ;;  %s2228_s6 = scalar_lea.vmem %s1753_s9, 128 }
 0xb51   :  { %v1429_v14 = vpop.permute.xlu0 %1428  ;;  %v2089_v9 = vpack.c.bf16 %v1667_v8, %v1666_v6  ;;  %p2229_p10 = scmp.ne.s32.totalorder %s1753_s9, %s2228_s6  ;;  %p2234_p12 = scmp.lt.s32.totalorder %s2228_s6, %s2228_s6 }
 0xb52   :  { %v1425_v13 = vpop.permute.xlu1 %1424 }
 0xb53   :  { %v1438_v15 = vsel %vm1437_vm8, %v1436_v50, %v1425_v13  ;;  %2090 = vmatpush3.bf16.msra.mxu1 %v2089_v9  ;;  %v1671_v13 = vrot.slane %v70_v60, %v415_v7  ;;  %p2235_p13 = por %p2234_p12, %p2233_p11 }
 0xb54   :  { %v1440_v16 = vsel %vm1439_vm9, %v1438_v15, %v1429_v14 }
 0xb55   :  { %2009 = vmatmul.mubr.msk.f32.vlgmr.msra.gmra.mrb[22].mxu0 %vm669_vm6, %v1440_v16  ;;  %v2123_v23 = vpop.permute.xlu0 %2122  ;;  %p2236_p0 = pnand %p2235_p13, %p2229_p10 }
 0xb56   :  { %2027 = vmatprep.mubr.msk.f32.mxu0 %vm2263_vm2, %v2261_v0  ;;  %v2118_v17 = vpop.permute.xlu1 %2117  ;;  %v2125_v24 = vunpack.i.h.bf16 %v2123_v23  ;;  %v2124_v25 = vunpack.i.l.bf16 %v2123_v23 }
 0xb57   :  { %v2120_v18 = vunpack.i.h.bf16 %v2118_v17  ;;  %v2119_v19 = vunpack.i.l.bf16 %v2118_v17 }
 0xb58   :  { %v2077_v28 = vpack.c.bf16 %v2125_v24, %v2124_v25 }
 0xb59   :  { %v2074_v22 = vpack.c.bf16 %v2120_v18, %v2119_v19  ;;  %v2133_v33 = vpop.permute.xlu0 %2132 }
 0xb5a   :  { %v2128_v29 = vpop.permute.xlu1 %2127  ;;  %v2135_v0 = vunpack.i.h.bf16 %v2133_v33  ;;  %v2134_v34 = vunpack.i.l.bf16 %v2133_v33 }
 0xb5b   :  { %2075 = vmatpush3.bf16.msra.mxu0 %v2074_v22  ;;  %v2130_v30 = vunpack.i.h.bf16 %v2128_v29  ;;  %v2129_v31 = vunpack.i.l.bf16 %v2128_v29 }
 0xb5c   :  { %2076 = vmatprep.subr.bf16.mxu0 %v2267_v62  ;;  %v2083_v35 = vpack.c.bf16 %v2135_v0, %v2134_v34 }
 0xb5d   :  { %v2080_v32 = vpack.c.bf16 %v2130_v30, %v2129_v31 }
 0xb5f   :  { %2078 = vmatpush3.bf16.msra.mxu0 %v2077_v28 }
 0xb60   :  { %2079 = vmatprep.subr.bf16.mxu0 %v2267_v62 }
 0xb63   :  { %2081 = vmatpush3.bf16.msra.mxu0 %v2080_v32 }
 0xb64   :  { %2082 = vmatprep.subr.bf16.mxu0 %v2267_v62 }
 0xb67   :  { %2084 = vmatpush3.bf16.msra.mxu0 %v2083_v35 }
 0xc28   :  { %v1518_v37 = vpop.f32.mrb[22].mxu0 }
 0xc29   :  { %v1519_v38 = vadd.f32 %v1518_v37, %v2486_v12  ;;  %v2010_v39 = vpop.f32.mrb[23].mxu0 }
 0xc2b   :  { %v1522_v40 = vsel %vm669_vm6, %v1519_v38, 0.0 }
 0xc2c   :  { %v1523_v41 = vrot.slane %v1522_v40, 4 }
 0xc2e   :  { %v1524_v42 = vadd.f32 %v1523_v41, %v1522_v40 }
 0xc30   :  { %v1525_v43 = vrot.slane %v1524_v42, 2 }
 0xc32   :  { %v1526_v45 = vadd.f32 %v1525_v43, %v1524_v42 }
 0xc34   :  { %v1527_v46 = vrot.slane %v1526_v45, 1 }
 0xc36   :  { %v1528_v48 = vadd.f32 %v1527_v46, %v1526_v45 }
 0xc38   :  { %v1529_v49 = vmul.f32 0.125, %v1528_v48 }
 0xc3a   :  { %v1530_v51 = vsub.f32 %v1519_v38, %v1529_v49 }
 0xc3c   :  { %v1531_v52 = vmul.f32 %v1530_v51, %v1530_v51 }
 0xc3e   :  { %v1532_v53 = vsel %vm669_vm6, %v1531_v52, 0.0 }
 0xc3f   :  { %v1533_v54 = vrot.slane %v1532_v53, 4 }
 0xc41   :  { %v1534_v56 = vadd.f32 %v1533_v54, %v1532_v53 }
 0xc43   :  { %v1535_v62 = vrot.slane %v1534_v56, 2 }
 0xc45   :  { %v1536_v26 = vadd.f32 %v1535_v62, %v1534_v56 }
 0xc47   :  { %v1537_v57 = vrot.slane %v1536_v26, 1 }
 0xc49   :  { %v1538_v12 = vadd.f32 %v1537_v57, %v1536_v26 }
 0xc4b   :  { %v1539_v58 = vmul.f32 0.125, %v1538_v12 }
 0xc4d   :  { %v1540_v59 = vadd.f32 1e-05, %v1539_v58 }
 0xc4f   :  { %2160 = vrsqrt.f32 %v1540_v59 }
 0xc59   :  { %v2161_v63 = vpop.eup %2160 }
 0xc5a   :  { %v1542_v1 = vmul.f32 %v2161_v63, %v1530_v51 }
 0xc5c   :  { %v1547_v2 = vmul.f32 %v1546_v61, %v1542_v1 }
 0xc5e   :  { %v1552_v4 = vadd.f32 %v1551_v44, %v1547_v2 }
 0xc60   :  { %v1553_v5 = vmax.f32 %v1552_v4, 0.0 }
 0xc62   :  { %2028 = vmatmul.mubr.msk.f32.vlgmr.msra.gmra.mrb[24].mxu0 %vm669_vm6, %v1553_v5 }
 0xd35   :  { %v1659_v10 = vpop.f32.mrb[24].mxu0 }
 0xd36   :  { %v1660_v21 = vadd.f32 %v1659_v10, %v1557_v27  ;;  %v2029_v11 = vpop.f32.mrb[25].mxu0 }
 0xd38   :  { %v1663_v50 = vmax.f32 %v1660_v21, 0.0 }
 0xd3a   :  { %2039 = vmatmul.mubr.msk.f32.vlgmr.msra.gmra.mrb[18].mxu1 %vm177_vm3, %v1663_v50 }
 0xe0d   :  { %v1741_v14 = vpop.f32.mrb[18].mxu1 }
 0xe0e   :  { %v1742_v15 = vadd.f32 %v1741_v14, %v1671_v13  ;;  %v2040_v16 = vpop.f32.mrb[19].mxu1 }
 0xe10   :  { %1745 = vst [vmem:[#allocation8] sm:$0xff] %v1742_v15 }
 0xe11   :  { %2239 = shalt.err (!%p2236_p0)
}
 0xe12   :  { %s2240_s12 = scalar_lea.hbm %s2712_s8, 128 }
 0xe13   :  { %p2241_p1 = scmp.ne.s32.totalorder %s2712_s8, %s2240_s12  ;;  %p2244_p2 = scmp.lt.u32.totalorder %s2240_s12, %s2712_s8 }
 0xe15   :  { %p2246_p3 = pnand %p2244_p2, %p2241_p1 }
 0xe17   :  { %2249 = shalt.err (!%p2246_p3)
}
 0xe18   :  { %1755 = dma.vmem_to_hbm [thread:$0]  %s1753_s9, 128, %s2712_s8, [#allocation4]  }
 0xe19   :  { %2254 = dma.done.wait [#allocation4], 128  }
 0xe1a   :  { %2255 = vsyncadd [#allocation4], 4294967168 }
 0xe1b   :  { %1759 = vsyncpa [#allocation3], 1 }
 0xe1c   :  { %1760 = vsyncpa [#allocation6], 1 }
 0xe1d   :  { %1761 = vsyncpa [#allocation4], 1 }

</bundles_post_ra>
